<compile_context>
chip_gen: v7x
topology: tpu7x:2x2x1
jax: 0.10.0
libtpu: 0.0.40
codegen_flags: <defaults>
</compile_context>

<pallas_src>
import math

import jax
import jax.numpy as jnp
from jax.experimental import pallas as pl
from jax.experimental.pallas import tpu as pltpu

# ---------------- small model config (consistent with the torch module) ----------------
VOCAB = 64
NUM_LAYERS = 2
NUM_Q_HEADS = 4
NUM_KV_HEADS = 2
EMB = 32
SEQ = 8                        # len_sequence == max_seq_len
HEAD_DIM = EMB // NUM_Q_HEADS  # 8
HALF = HEAD_DIM // 2           # 4
INTERMEDIATE = 64
EPS = 1e-5

Q_WIDTH = NUM_Q_HEADS * HEAD_DIM        # 32
KV_WIDTH = NUM_KV_HEADS * HEAD_DIM      # 16
QKV_WIDTH = Q_WIDTH + 2 * KV_WIDTH      # 64
QKV_EXT_WIDTH = 128                     # qkv(64) + q_swap(32) + k_swap(16) + zero pad(16)
GU_WIDTH = 2 * INTERMEDIATE             # 128  (lane-dense gate+up output)


def _rmsnorm(x, gamma):
    # x: [S, E], gamma: [1, E]
    ms = jnp.mean(x * x, axis=-1, keepdims=True)
    return gamma * (x * jax.lax.rsqrt(ms + EPS))


# ---------------- the single fused kernel ----------------
def llama_fused_kernel(tok_ref,                                 # SMEM [S] int32
                       emb_ref,                                 # VMEM [V, 1, E]
                       wqkv_ref, wo_ref, wgu_ref, wd_ref,       # stacked per-layer weights
                       g_attn_ref, g_ffn_ref,                   # [L, 1, E]
                       cos_q_ref, sin_q_ref, cos_k_ref, sin_k_ref,
                       mask_ref, final_gamma_ref, w_out_ref,
                       out_ref,                                 # [1, 1] int32
                       x_scratch):                              # VMEM [S, E] f32
    # ---- embedding lookup: SMEM token ids -> dynamic row loads from VMEM table ----
    for s in range(SEQ):
        x_scratch[pl.ds(s, 1), :] = emb_ref[tok_ref[s]]         # [1, E]
    x = x_scratch[...]                                          # [S, E]

    mask = mask_ref[...]                                        # [S, S] additive causal
    cos_q = cos_q_ref[...]                                      # [S, 32] (1/sqrt(hd) folded in)
    sin_q = sin_q_ref[...]                                      # [S, 32] (signed, scaled)
    cos_k = cos_k_ref[...]                                      # [S, 16]
    sin_k = sin_k_ref[...]                                      # [S, 16] (signed)

    group = NUM_Q_HEADS // NUM_KV_HEADS

    for l in range(NUM_LAYERS):                                 # statically unrolled
        # ---------------- attention block ----------------
        xn = _rmsnorm(x, g_attn_ref[l])
        # one [S,32]@[32,128] matmul produces q, k, v AND their half-swapped copies
        # (the half-swap permutation is pre-folded into the weight matrix).
        qkv = jnp.dot(xn, wqkv_ref[l], preferred_element_type=jnp.float32)   # [S, 128]
        q = qkv[:, :Q_WIDTH]
        k = qkv[:, Q_WIDTH:Q_WIDTH + KV_WIDTH]
        v = qkv[:, Q_WIDTH + KV_WIDTH:QKV_WIDTH]
        q_swap = qkv[:, QKV_WIDTH:QKV_WIDTH + Q_WIDTH]
        k_swap = qkv[:, QKV_WIDTH + Q_WIDTH:QKV_WIDTH + Q_WIDTH + KV_WIDTH]

        # RoPE: t*cos + swap(t)*sin_signed  (pure elementwise, tables are constants)
        q_rot = q * cos_q + q_swap * sin_q                      # already 1/sqrt(hd) scaled
        k_rot = k * cos_k + k_swap * sin_k

        # per-kv-head views hoisted out of the q-head loop
        kh_list = [k_rot[:, i * HEAD_DIM:(i + 1) * HEAD_DIM] for i in range(NUM_KV_HEADS)]
        vh_list = [v[:, i * HEAD_DIM:(i + 1) * HEAD_DIM] for i in range(NUM_KV_HEADS)]

        wo_l = wo_ref[l]                                        # [32, E]
        attn = jnp.zeros((SEQ, EMB), jnp.float32)
        for h in range(NUM_Q_HEADS):
            kv = h // group
            qh = q_rot[:, h * HEAD_DIM:(h + 1) * HEAD_DIM]      # [S, hd], already scaled
            kh = kh_list[kv]
            vh = vh_list[kv]

            scores = jax.lax.dot_general(qh, kh, (((1,), (1,)), ((), ())),
                                         preferred_element_type=jnp.float32) + mask
            m = jnp.max(scores, axis=-1, keepdims=True)
            e = jnp.exp(scores - m)
            p = e / jnp.sum(e, axis=-1, keepdims=True)
            oh = jnp.dot(p, vh, preferred_element_type=jnp.float32)           # [S, hd]
            # accumulate straight through this head's block of w_o (no concat)
            attn = attn + jnp.dot(oh, wo_l[h * HEAD_DIM:(h + 1) * HEAD_DIM, :],
                                  preferred_element_type=jnp.float32)

        skip = x + attn

        # ---------------- SwiGLU feed-forward ----------------
        yn = _rmsnorm(skip, g_ffn_ref[l])
        gu = jnp.dot(yn, wgu_ref[l], preferred_element_type=jnp.float32)      # [S, 128]
        gate = gu[:, :INTERMEDIATE]
        up = gu[:, INTERMEDIATE:]
        hidden = (gate * jax.nn.sigmoid(gate)) * up
        x = skip + jnp.dot(hidden, wd_ref[l], preferred_element_type=jnp.float32)

    # ---------------- final RMSNorm + LM head on last position only ----------------
    x_last = x[SEQ - 1:SEQ, :]                                  # [1, E]
    xn = _rmsnorm(x_last, final_gamma_ref[...])
    logits = jnp.dot(xn, w_out_ref[...], preferred_element_type=jnp.float32)  # [1, V]
    # argmax over logits (== argmax over softmax probs); first maximal index
    m = jnp.max(logits, axis=-1, keepdims=True)
    idx = jax.lax.broadcasted_iota(jnp.int32, logits.shape, 1)
    masked = jnp.where(logits == m, idx, jnp.int32(VOCAB))
    out_ref[...] = jnp.min(masked, axis=-1, keepdims=True)      # [1, 1] int32


# ---------------- wrapper-side constants ----------------
def rope_half_tables():
    # matches generate_rotation_magnitudes: theta[s, i] = s / 10000^(2i / head_dim)
    pos = jnp.arange(SEQ, dtype=jnp.float32)[:, None]                            # [S, 1]
    inv = 1.0 / (10000.0 ** (jnp.arange(0, HEAD_DIM, 2, dtype=jnp.float32) / HEAD_DIM))
    theta = pos * inv[None, :]                                                   # [S, hd/2]
    theta = jnp.concatenate([theta, theta], axis=-1)                             # [S, hd]
    return jnp.cos(theta), jnp.sin(theta)


def _half_swap_perm(n_heads):
    # permutation matrix swapping the two halves inside every head block (involution);
    # (t @ P)[:, j] = t[:, swap(j)]  ->  first half lanes get second half values & v.v.
    dim = n_heads * HEAD_DIM
    src = []
    for h in range(n_heads):
        for d in range(HEAD_DIM):
            sd = d + HALF if d < HALF else d - HALF
            src.append(h * HEAD_DIM + sd)
    return jnp.eye(dim, dtype=jnp.float32)[jnp.array(src, jnp.int32)]


def build_rope_constants():
    cos, sin = rope_half_tables()                                                # [S, hd]
    sign = jnp.concatenate([-jnp.ones((HALF,), jnp.float32),
                            jnp.ones((HALF,), jnp.float32)])                     # [hd]
    sin_signed = sin * sign[None, :]
    scale = 1.0 / math.sqrt(HEAD_DIM)                                            # fold into Q tables
    cos_q = jnp.tile(cos, (1, NUM_Q_HEADS)) * scale                              # [S, 32]
    sin_q = jnp.tile(sin_signed, (1, NUM_Q_HEADS)) * scale                       # [S, 32]
    cos_k = jnp.tile(cos, (1, NUM_KV_HEADS))                                     # [S, 16]
    sin_k = jnp.tile(sin_signed, (1, NUM_KV_HEADS))                              # [S, 16]
    return cos_q, sin_q, cos_k, sin_k


def build_causal_mask():
    row = jnp.arange(SEQ)[:, None]
    col = jnp.arange(SEQ)[None, :]
    return jnp.where(col <= row, 0.0, -jnp.inf).astype(jnp.float32)              # [S, S]


def init_params(key):
    scale = 0.02

    def draw(shape):
        nonlocal key
        key, sub = jax.random.split(key)
        return jax.random.normal(sub, shape, jnp.float32) * scale

    params = {
        "embedding": draw((VOCAB, EMB)),
        "w_out": draw((EMB, VOCAB)),
        "final_gamma": jnp.ones((1, EMB), jnp.float32),
        # per-layer weights stacked on a leading axis (layouts already x @ W)
        "wq": jnp.stack([draw((EMB, Q_WIDTH)) for _ in range(NUM_LAYERS)]),
        "wk": jnp.stack([draw((EMB, KV_WIDTH)) for _ in range(NUM_LAYERS)]),
        "wv": jnp.stack([draw((EMB, KV_WIDTH)) for _ in range(NUM_LAYERS)]),
        "wo": jnp.stack([draw((Q_WIDTH, EMB)) for _ in range(NUM_LAYERS)]),
        "wgate": jnp.stack([draw((EMB, INTERMEDIATE)) for _ in range(NUM_LAYERS)]),
        "wup":   jnp.stack([draw((EMB, INTERMEDIATE)) for _ in range(NUM_LAYERS)]),
        "wd":    jnp.stack([draw((INTERMEDIATE, EMB)) for _ in range(NUM_LAYERS)]),
        "g_attn": jnp.ones((NUM_LAYERS, 1, EMB), jnp.float32),
        "g_ffn":  jnp.ones((NUM_LAYERS, 1, EMB), jnp.float32),
    }
    return params


def prepare_inputs(params):
    """One-time weight fusion done outside the kernel / outside jit."""
    # Fold the (position-independent) RoPE half-swap permutation into the QKV weights:
    #   (xn @ Wq) @ P == xn @ (Wq @ P)
    pq = _half_swap_perm(NUM_Q_HEADS)                                            # [32, 32]
    pk = _half_swap_perm(NUM_KV_HEADS)                                           # [16, 16]
    wq_swap = jnp.einsum("led,df->lef", params["wq"], pq)                        # [L, E, 32]
    wk_swap = jnp.einsum("led,df->lef", params["wk"], pk)                        # [L, E, 16]
    pad = jnp.zeros((NUM_LAYERS, EMB,
                     QKV_EXT_WIDTH - (QKV_WIDTH + Q_WIDTH + KV_WIDTH)), jnp.float32)
    wqkv_ext = jnp.concatenate(
        [params["wq"], params["wk"], params["wv"], wq_swap, wk_swap, pad], axis=-1)  # [L,E,128]

    wgu = jnp.concatenate([params["wgate"], params["wup"]], axis=-1)             # [L, E, 128]

    cos_q, sin_q, cos_k, sin_k = build_rope_constants()
    return {
        "embedding": params["embedding"].reshape(VOCAB, 1, EMB),   # leading-axis row gather
        "wqkv_ext": wqkv_ext,
        "wo": params["wo"],
        "wgu": wgu,
        "wd": params["wd"],
        "g_attn": params["g_attn"],
        "g_ffn": params["g_ffn"],
        "cos_q": cos_q, "sin_q": sin_q, "cos_k": cos_k, "sin_k": sin_k,
        "mask": build_causal_mask(),
        "final_gamma": params["final_gamma"],
        "w_out": params["w_out"],
    }


@jax.jit
def llama_forward(tokens, fused):
    vmem = pl.BlockSpec(memory_space=pltpu.MemorySpace.VMEM)
    smem = pl.BlockSpec(memory_space=pltpu.MemorySpace.SMEM)

    out = pl.pallas_call(
        llama_fused_kernel,
        out_shape=jax.ShapeDtypeStruct((1, 1), jnp.int32),
        in_specs=[smem] + [vmem] * 14,
        out_specs=vmem,
        scratch_shapes=[pltpu.VMEM((SEQ, EMB), jnp.float32)],
    )(
        tokens,
        fused["embedding"],
        fused["wqkv_ext"], fused["wo"], fused["wgu"], fused["wd"],
        fused["g_attn"], fused["g_ffn"],
        fused["cos_q"], fused["sin_q"], fused["cos_k"], fused["sin_k"],
        fused["mask"], fused["final_gamma"], fused["w_out"],
    )
    return out[0, 0]                                  # scalar int32 next-token id


if __name__ == "__main__":
    key = jax.random.PRNGKey(0)
    key, tok_key = jax.random.split(key)
    tokens = jax.random.randint(tok_key, (SEQ,), 0, VOCAB, dtype=jnp.int32)

    params = init_params(jax.random.PRNGKey(0))
    fused = prepare_inputs(params)

    next_token = llama_forward(tokens, fused)
    jax.block_until_ready(next_token)
    assert next_token.shape == () and next_token.dtype == jnp.int32
    print("KERNEL_OK")
</pallas_src>

<mosaic_0001>
module attributes {stable_mosaic.version = 11 : i64} {
  func.func @llama_fused_kernel(%arg0: memref<8xi32, #tpu.memory_space<smem>>, %arg1: memref<64x1x32xf32, #tpu.memory_space<vmem>>, %arg2: memref<2x32x128xf32, #tpu.memory_space<vmem>>, %arg3: memref<2x32x32xf32, #tpu.memory_space<vmem>>, %arg4: memref<2x32x128xf32, #tpu.memory_space<vmem>>, %arg5: memref<2x64x32xf32, #tpu.memory_space<vmem>>, %arg6: memref<2x1x32xf32, #tpu.memory_space<vmem>>, %arg7: memref<2x1x32xf32, #tpu.memory_space<vmem>>, %arg8: memref<8x32xf32, #tpu.memory_space<vmem>>, %arg9: memref<8x32xf32, #tpu.memory_space<vmem>>, %arg10: memref<8x16xf32, #tpu.memory_space<vmem>>, %arg11: memref<8x16xf32, #tpu.memory_space<vmem>>, %arg12: memref<8x8xf32, #tpu.memory_space<vmem>>, %arg13: memref<1x32xf32, #tpu.memory_space<vmem>>, %arg14: memref<32x64xf32, #tpu.memory_space<vmem>>, %arg15: memref<1x1xi32, #tpu.memory_space<vmem>>, %arg16: memref<8x32xf32, #tpu.memory_space<vmem>>) attributes {dimension_semantics = [], scalar_prefetch = 0 : i64, scratch_operands = 1 : i64, tpu.core_type = #tpu.core_type<tc>} {
    %c0 = arith.constant 0 : index
    %0 = memref.load %arg0[%c0] : memref<8xi32, #tpu.memory_space<smem>>
    %1 = arith.index_cast %0 : i32 to index
    %c0_0 = arith.constant 0 : index
    %c0_1 = arith.constant 0 : index
    %2 = vector.load %arg1[%1, %c0_0, %c0_1] : memref<64x1x32xf32, #tpu.memory_space<vmem>>, vector<1x1x32xf32>
    %3 = vector.shape_cast %2 : vector<1x1x32xf32> to vector<1x32xf32>
    %c0_2 = arith.constant 0 : index
    %c0_3 = arith.constant 0 : index
    %4 = vector.load %arg16[%c0_2, %c0_3] : memref<8x32xf32, #tpu.memory_space<vmem>>, vector<1x32xf32>
    tpu.vector_store %arg16[%c0_2, %c0_3], %3 {strides = array<i32>} : memref<8x32xf32, #tpu.memory_space<vmem>>, vector<1x32xf32>,
    %c1 = arith.constant 1 : index
    %5 = memref.load %arg0[%c1] : memref<8xi32, #tpu.memory_space<smem>>
    %6 = arith.index_cast %5 : i32 to index
    %c0_4 = arith.constant 0 : index
    %c0_5 = arith.constant 0 : index
    %7 = vector.load %arg1[%6, %c0_4, %c0_5] : memref<64x1x32xf32, #tpu.memory_space<vmem>>, vector<1x1x32xf32>
    %8 = vector.shape_cast %7 : vector<1x1x32xf32> to vector<1x32xf32>
    %c1_6 = arith.constant 1 : index
    %c0_7 = arith.constant 0 : index
    %9 = vector.load %arg16[%c1_6, %c0_7] : memref<8x32xf32, #tpu.memory_space<vmem>>, vector<1x32xf32>
    tpu.vector_store %arg16[%c1_6, %c0_7], %8 {strides = array<i32>} : memref<8x32xf32, #tpu.memory_space<vmem>>, vector<1x32xf32>,
    %c2 = arith.constant 2 : index
    %10 = memref.load %arg0[%c2] : memref<8xi32, #tpu.memory_space<smem>>
    %11 = arith.index_cast %10 : i32 to index
    %c0_8 = arith.constant 0 : index
    %c0_9 = arith.constant 0 : index
    %12 = vector.load %arg1[%11, %c0_8, %c0_9] : memref<64x1x32xf32, #tpu.memory_space<vmem>>, vector<1x1x32xf32>
    %13 = vector.shape_cast %12 : vector<1x1x32xf32> to vector<1x32xf32>
    %c2_10 = arith.constant 2 : index
    %c0_11 = arith.constant 0 : index
    %14 = vector.load %arg16[%c2_10, %c0_11] : memref<8x32xf32, #tpu.memory_space<vmem>>, vector<1x32xf32>
    tpu.vector_store %arg16[%c2_10, %c0_11], %13 {strides = array<i32>} : memref<8x32xf32, #tpu.memory_space<vmem>>, vector<1x32xf32>,
    %c3 = arith.constant 3 : index
    %15 = memref.load %arg0[%c3] : memref<8xi32, #tpu.memory_space<smem>>
    %16 = arith.index_cast %15 : i32 to index
    %c0_12 = arith.constant 0 : index
    %c0_13 = arith.constant 0 : index
    %17 = vector.load %arg1[%16, %c0_12, %c0_13] : memref<64x1x32xf32, #tpu.memory_space<vmem>>, vector<1x1x32xf32>
    %18 = vector.shape_cast %17 : vector<1x1x32xf32> to vector<1x32xf32>
    %c3_14 = arith.constant 3 : index
    %c0_15 = arith.constant 0 : index
    %19 = vector.load %arg16[%c3_14, %c0_15] : memref<8x32xf32, #tpu.memory_space<vmem>>, vector<1x32xf32>
    tpu.vector_store %arg16[%c3_14, %c0_15], %18 {strides = array<i32>} : memref<8x32xf32, #tpu.memory_space<vmem>>, vector<1x32xf32>,
    %c4 = arith.constant 4 : index
    %20 = memref.load %arg0[%c4] : memref<8xi32, #tpu.memory_space<smem>>
    %21 = arith.index_cast %20 : i32 to index
    %c0_16 = arith.constant 0 : index
    %c0_17 = arith.constant 0 : index
    %22 = vector.load %arg1[%21, %c0_16, %c0_17] : memref<64x1x32xf32, #tpu.memory_space<vmem>>, vector<1x1x32xf32>
    %23 = vector.shape_cast %22 : vector<1x1x32xf32> to vector<1x32xf32>
    %c4_18 = arith.constant 4 : index
    %c0_19 = arith.constant 0 : index
    %24 = vector.load %arg16[%c4_18, %c0_19] : memref<8x32xf32, #tpu.memory_space<vmem>>, vector<1x32xf32>
    tpu.vector_store %arg16[%c4_18, %c0_19], %23 {strides = array<i32>} : memref<8x32xf32, #tpu.memory_space<vmem>>, vector<1x32xf32>,
    %c5 = arith.constant 5 : index
    %25 = memref.load %arg0[%c5] : memref<8xi32, #tpu.memory_space<smem>>
    %26 = arith.index_cast %25 : i32 to index
    %c0_20 = arith.constant 0 : index
    %c0_21 = arith.constant 0 : index
    %27 = vector.load %arg1[%26, %c0_20, %c0_21] : memref<64x1x32xf32, #tpu.memory_space<vmem>>, vector<1x1x32xf32>
    %28 = vector.shape_cast %27 : vector<1x1x32xf32> to vector<1x32xf32>
    %c5_22 = arith.constant 5 : index
    %c0_23 = arith.constant 0 : index
    %29 = vector.load %arg16[%c5_22, %c0_23] : memref<8x32xf32, #tpu.memory_space<vmem>>, vector<1x32xf32>
    tpu.vector_store %arg16[%c5_22, %c0_23], %28 {strides = array<i32>} : memref<8x32xf32, #tpu.memory_space<vmem>>, vector<1x32xf32>,
    %c6 = arith.constant 6 : index
    %30 = memref.load %arg0[%c6] : memref<8xi32, #tpu.memory_space<smem>>
    %31 = arith.index_cast %30 : i32 to index
    %c0_24 = arith.constant 0 : index
    %c0_25 = arith.constant 0 : index
    %32 = vector.load %arg1[%31, %c0_24, %c0_25] : memref<64x1x32xf32, #tpu.memory_space<vmem>>, vector<1x1x32xf32>
    %33 = vector.shape_cast %32 : vector<1x1x32xf32> to vector<1x32xf32>
    %c6_26 = arith.constant 6 : index
    %c0_27 = arith.constant 0 : index
    %34 = vector.load %arg16[%c6_26, %c0_27] : memref<8x32xf32, #tpu.memory_space<vmem>>, vector<1x32xf32>
    tpu.vector_store %arg16[%c6_26, %c0_27], %33 {strides = array<i32>} : memref<8x32xf32, #tpu.memory_space<vmem>>, vector<1x32xf32>,
    %c7 = arith.constant 7 : index
    %35 = memref.load %arg0[%c7] : memref<8xi32, #tpu.memory_space<smem>>
    %36 = arith.index_cast %35 : i32 to index
    %c0_28 = arith.constant 0 : index
    %c0_29 = arith.constant 0 : index
    %37 = vector.load %arg1[%36, %c0_28, %c0_29] : memref<64x1x32xf32, #tpu.memory_space<vmem>>, vector<1x1x32xf32>
    %38 = vector.shape_cast %37 : vector<1x1x32xf32> to vector<1x32xf32>
    %c7_30 = arith.constant 7 : index
    %c0_31 = arith.constant 0 : index
    %39 = vector.load %arg16[%c7_30, %c0_31] : memref<8x32xf32, #tpu.memory_space<vmem>>, vector<1x32xf32>
    tpu.vector_store %arg16[%c7_30, %c0_31], %38 {strides = array<i32>} : memref<8x32xf32, #tpu.memory_space<vmem>>, vector<1x32xf32>,
    %c0_32 = arith.constant 0 : index
    %c0_33 = arith.constant 0 : index
    %40 = vector.load %arg16[%c0_32, %c0_33] : memref<8x32xf32, #tpu.memory_space<vmem>>, vector<8x32xf32>
    %c0_34 = arith.constant 0 : index
    %c0_35 = arith.constant 0 : index
    %41 = vector.load %arg12[%c0_34, %c0_35] : memref<8x8xf32, #tpu.memory_space<vmem>>, vector<8x8xf32>
    %c0_36 = arith.constant 0 : index
    %c0_37 = arith.constant 0 : index
    %42 = vector.load %arg8[%c0_36, %c0_37] : memref<8x32xf32, #tpu.memory_space<vmem>>, vector<8x32xf32>
    %c0_38 = arith.constant 0 : index
    %c0_39 = arith.constant 0 : index
    %43 = vector.load %arg9[%c0_38, %c0_39] : memref<8x32xf32, #tpu.memory_space<vmem>>, vector<8x32xf32>
    %c0_40 = arith.constant 0 : index
    %c0_41 = arith.constant 0 : index
    %44 = vector.load %arg10[%c0_40, %c0_41] : memref<8x16xf32, #tpu.memory_space<vmem>>, vector<8x16xf32>
    %c0_42 = arith.constant 0 : index
    %c0_43 = arith.constant 0 : index
    %45 = vector.load %arg11[%c0_42, %c0_43] : memref<8x16xf32, #tpu.memory_space<vmem>>, vector<8x16xf32>
    %c0_44 = arith.constant 0 : index
    %c0_45 = arith.constant 0 : index
    %c0_46 = arith.constant 0 : index
    %46 = vector.load %arg6[%c0_44, %c0_45, %c0_46] : memref<2x1x32xf32, #tpu.memory_space<vmem>>, vector<1x1x32xf32>
    %47 = vector.shape_cast %46 : vector<1x1x32xf32> to vector<1x32xf32>
    %48 = arith.mulf %40, %40 : vector<8x32xf32>
    %cst = arith.constant dense<0.000000e+00> : vector<8xf32>
    %49 = vector.multi_reduction <add>, %48, %cst [1] : vector<8x32xf32> to vector<8xf32>
    %50 = vector.shape_cast %49 : vector<8xf32> to vector<8x1xf32>
    %cst_47 = arith.constant 3.200000e+01 : f32
    %51 = vector.broadcast %cst_47 : f32 to vector<8x1xf32>
    %52 = arith.divf %50, %51 : vector<8x1xf32>
    %cst_48 = arith.constant 9.99999974E-6 : f32
    %53 = vector.broadcast %cst_48 : f32 to vector<8x1xf32>
    %54 = arith.addf %52, %53 : vector<8x1xf32>
    %55 = math.rsqrt %54 : vector<8x1xf32>
    %56 = vector.broadcast %55 : vector<8x1xf32> to vector<8x32xf32>
    %57 = arith.mulf %40, %56 : vector<8x32xf32>
    %58 = vector.broadcast %47 : vector<1x32xf32> to vector<8x32xf32>
    %59 = arith.mulf %58, %57 : vector<8x32xf32>
    %c0_49 = arith.constant 0 : index
    %c0_50 = arith.constant 0 : index
    %c0_51 = arith.constant 0 : index
    %60 = vector.load %arg2[%c0_49, %c0_50, %c0_51] : memref<2x32x128xf32, #tpu.memory_space<vmem>>, vector<1x32x128xf32>
    %61 = vector.shape_cast %60 : vector<1x32x128xf32> to vector<32x128xf32>
    %cst_52 = arith.constant dense<0.000000e+00> : vector<8x128xf32>
    %62 = tpu.matmul %59, %61, %cst_52 {dimension_numbers = #tpu.dot_dimension_numbers<[1], [0], [0], [1], [0, 0, 1, 1], [], []>} : vector<8x32xf32>, vector<32x128xf32>, vector<8x128xf32> -> vector<8x128xf32>
    %63 = vector.extract_strided_slice %62 {offsets = [0, 0], sizes = [8, 32], strides = [1, 1]} : vector<8x128xf32> to vector<8x32xf32>
    %64 = vector.extract_strided_slice %62 {offsets = [0, 32], sizes = [8, 16], strides = [1, 1]} : vector<8x128xf32> to vector<8x16xf32>
    %65 = vector.extract_strided_slice %62 {offsets = [0, 48], sizes = [8, 16], strides = [1, 1]} : vector<8x128xf32> to vector<8x16xf32>
    %66 = vector.extract_strided_slice %62 {offsets = [0, 64], sizes = [8, 32], strides = [1, 1]} : vector<8x128xf32> to vector<8x32xf32>
    %67 = vector.extract_strided_slice %62 {offsets = [0, 96], sizes = [8, 16], strides = [1, 1]} : vector<8x128xf32> to vector<8x16xf32>
    %68 = arith.mulf %63, %42 : vector<8x32xf32>
    %69 = arith.mulf %66, %43 : vector<8x32xf32>
    %70 = arith.addf %68, %69 : vector<8x32xf32>
    %71 = arith.mulf %64, %44 : vector<8x16xf32>
    %72 = arith.mulf %67, %45 : vector<8x16xf32>
    %73 = arith.addf %71, %72 : vector<8x16xf32>
    %74 = vector.extract_strided_slice %73 {offsets = [0, 0], sizes = [8, 8], strides = [1, 1]} : vector<8x16xf32> to vector<8x8xf32>
    %75 = vector.extract_strided_slice %73 {offsets = [0, 8], sizes = [8, 8], strides = [1, 1]} : vector<8x16xf32> to vector<8x8xf32>
    %76 = vector.extract_strided_slice %65 {offsets = [0, 0], sizes = [8, 8], strides = [1, 1]} : vector<8x16xf32> to vector<8x8xf32>
    %77 = vector.extract_strided_slice %65 {offsets = [0, 8], sizes = [8, 8], strides = [1, 1]} : vector<8x16xf32> to vector<8x8xf32>
    %c0_53 = arith.constant 0 : index
    %c0_54 = arith.constant 0 : index
    %c0_55 = arith.constant 0 : index
    %78 = vector.load %arg3[%c0_53, %c0_54, %c0_55] : memref<2x32x32xf32, #tpu.memory_space<vmem>>, vector<1x32x32xf32>
    %79 = vector.shape_cast %78 : vector<1x32x32xf32> to vector<32x32xf32>
    %cst_56 = arith.constant 0.000000e+00 : f32
    %80 = vector.broadcast %cst_56 : f32 to vector<8x32xf32>
    %81 = vector.extract_strided_slice %70 {offsets = [0, 0], sizes = [8, 8], strides = [1, 1]} : vector<8x32xf32> to vector<8x8xf32>
    %cst_57 = arith.constant dense<0.000000e+00> : vector<8x8xf32>
    %82 = tpu.matmul %81, %74, %cst_57 {dimension_numbers = #tpu.dot_dimension_numbers<[1], [1], [0], [0], [0, 0, 1, 0], [], []>} : vector<8x8xf32>, vector<8x8xf32>, vector<8x8xf32> -> vector<8x8xf32>
    %83 = arith.addf %82, %41 : vector<8x8xf32>
    %cst_58 = arith.constant dense<0xFF800000> : vector<8xf32>
    %84 = vector.multi_reduction <maximumf>, %83, %cst_58 [1] : vector<8x8xf32> to vector<8xf32>
    %85 = vector.shape_cast %84 : vector<8xf32> to vector<8x1xf32>
    %86 = vector.broadcast %85 : vector<8x1xf32> to vector<8x8xf32>
    %87 = arith.subf %83, %86 : vector<8x8xf32>
    %88 = math.exp %87 : vector<8x8xf32>
    %cst_59 = arith.constant dense<0.000000e+00> : vector<8xf32>
    %89 = vector.multi_reduction <add>, %88, %cst_59 [1] : vector<8x8xf32> to vector<8xf32>
    %90 = vector.shape_cast %89 : vector<8xf32> to vector<8x1xf32>
    %91 = vector.broadcast %90 : vector<8x1xf32> to vector<8x8xf32>
    %92 = arith.divf %88, %91 : vector<8x8xf32>
    %cst_60 = arith.constant dense<0.000000e+00> : vector<8x8xf32>
    %93 = tpu.matmul %92, %76, %cst_60 {dimension_numbers = #tpu.dot_dimension_numbers<[1], [0], [0], [1], [0, 0, 1, 1], [], []>} : vector<8x8xf32>, vector<8x8xf32>, vector<8x8xf32> -> vector<8x8xf32>
    %94 = vector.extract_strided_slice %79 {offsets = [0, 0], sizes = [8, 32], strides = [1, 1]} : vector<32x32xf32> to vector<8x32xf32>
    %cst_61 = arith.constant dense<0.000000e+00> : vector<8x32xf32>
    %95 = tpu.matmul %93, %94, %cst_61 {dimension_numbers = #tpu.dot_dimension_numbers<[1], [0], [0], [1], [0, 0, 1, 1], [], []>} : vector<8x8xf32>, vector<8x32xf32>, vector<8x32xf32> -> vector<8x32xf32>
    %96 = arith.addf %80, %95 : vector<8x32xf32>
    %97 = vector.extract_strided_slice %70 {offsets = [0, 8], sizes = [8, 8], strides = [1, 1]} : vector<8x32xf32> to vector<8x8xf32>
    %cst_62 = arith.constant dense<0.000000e+00> : vector<8x8xf32>
    %98 = tpu.matmul %97, %74, %cst_62 {dimension_numbers = #tpu.dot_dimension_numbers<[1], [1], [0], [0], [0, 0, 1, 0], [], []>} : vector<8x8xf32>, vector<8x8xf32>, vector<8x8xf32> -> vector<8x8xf32>
    %99 = arith.addf %98, %41 : vector<8x8xf32>
    %cst_63 = arith.constant dense<0xFF800000> : vector<8xf32>
    %100 = vector.multi_reduction <maximumf>, %99, %cst_63 [1] : vector<8x8xf32> to vector<8xf32>
    %101 = vector.shape_cast %100 : vector<8xf32> to vector<8x1xf32>
    %102 = vector.broadcast %101 : vector<8x1xf32> to vector<8x8xf32>
    %103 = arith.subf %99, %102 : vector<8x8xf32>
    %104 = math.exp %103 : vector<8x8xf32>
    %cst_64 = arith.constant dense<0.000000e+00> : vector<8xf32>
    %105 = vector.multi_reduction <add>, %104, %cst_64 [1] : vector<8x8xf32> to vector<8xf32>
    %106 = vector.shape_cast %105 : vector<8xf32> to vector<8x1xf32>
    %107 = vector.broadcast %106 : vector<8x1xf32> to vector<8x8xf32>
    %108 = arith.divf %104, %107 : vector<8x8xf32>
    %cst_65 = arith.constant dense<0.000000e+00> : vector<8x8xf32>
    %109 = tpu.matmul %108, %76, %cst_65 {dimension_numbers = #tpu.dot_dimension_numbers<[1], [0], [0], [1], [0, 0, 1, 1], [], []>} : vector<8x8xf32>, vector<8x8xf32>, vector<8x8xf32> -> vector<8x8xf32>
    %110 = vector.extract_strided_slice %79 {offsets = [8, 0], sizes = [8, 32], strides = [1, 1]} : vector<32x32xf32> to vector<8x32xf32>
    %cst_66 = arith.constant dense<0.000000e+00> : vector<8x32xf32>
    %111 = tpu.matmul %109, %110, %cst_66 {dimension_numbers = #tpu.dot_dimension_numbers<[1], [0], [0], [1], [0, 0, 1, 1], [], []>} : vector<8x8xf32>, vector<8x32xf32>, vector<8x32xf32> -> vector<8x32xf32>
    %112 = arith.addf %96, %111 : vector<8x32xf32>
    %113 = vector.extract_strided_slice %70 {offsets = [0, 16], sizes = [8, 8], strides = [1, 1]} : vector<8x32xf32> to vector<8x8xf32>
    %cst_67 = arith.constant dense<0.000000e+00> : vector<8x8xf32>
    %114 = tpu.matmul %113, %75, %cst_67 {dimension_numbers = #tpu.dot_dimension_numbers<[1], [1], [0], [0], [0, 0, 1, 0], [], []>} : vector<8x8xf32>, vector<8x8xf32>, vector<8x8xf32> -> vector<8x8xf32>
    %115 = arith.addf %114, %41 : vector<8x8xf32>
    %cst_68 = arith.constant dense<0xFF800000> : vector<8xf32>
    %116 = vector.multi_reduction <maximumf>, %115, %cst_68 [1] : vector<8x8xf32> to vector<8xf32>
    %117 = vector.shape_cast %116 : vector<8xf32> to vector<8x1xf32>
    %118 = vector.broadcast %117 : vector<8x1xf32> to vector<8x8xf32>
    %119 = arith.subf %115, %118 : vector<8x8xf32>
    %120 = math.exp %119 : vector<8x8xf32>
    %cst_69 = arith.constant dense<0.000000e+00> : vector<8xf32>
    %121 = vector.multi_reduction <add>, %120, %cst_69 [1] : vector<8x8xf32> to vector<8xf32>
    %122 = vector.shape_cast %121 : vector<8xf32> to vector<8x1xf32>
    %123 = vector.broadcast %122 : vector<8x1xf32> to vector<8x8xf32>
    %124 = arith.divf %120, %123 : vector<8x8xf32>
    %cst_70 = arith.constant dense<0.000000e+00> : vector<8x8xf32>
    %125 = tpu.matmul %124, %77, %cst_70 {dimension_numbers = #tpu.dot_dimension_numbers<[1], [0], [0], [1], [0, 0, 1, 1], [], []>} : vector<8x8xf32>, vector<8x8xf32>, vector<8x8xf32> -> vector<8x8xf32>
    %126 = vector.extract_strided_slice %79 {offsets = [16, 0], sizes = [8, 32], strides = [1, 1]} : vector<32x32xf32> to vector<8x32xf32>
    %cst_71 = arith.constant dense<0.000000e+00> : vector<8x32xf32>
    %127 = tpu.matmul %125, %126, %cst_71 {dimension_numbers = #tpu.dot_dimension_numbers<[1], [0], [0], [1], [0, 0, 1, 1], [], []>} : vector<8x8xf32>, vector<8x32xf32>, vector<8x32xf32> -> vector<8x32xf32>
    %128 = arith.addf %112, %127 : vector<8x32xf32>
    %129 = vector.extract_strided_slice %70 {offsets = [0, 24], sizes = [8, 8], strides = [1, 1]} : vector<8x32xf32> to vector<8x8xf32>
    %cst_72 = arith.constant dense<0.000000e+00> : vector<8x8xf32>
    %130 = tpu.matmul %129, %75, %cst_72 {dimension_numbers = #tpu.dot_dimension_numbers<[1], [1], [0], [0], [0, 0, 1, 0], [], []>} : vector<8x8xf32>, vector<8x8xf32>, vector<8x8xf32> -> vector<8x8xf32>
    %131 = arith.addf %130, %41 : vector<8x8xf32>
    %cst_73 = arith.constant dense<0xFF800000> : vector<8xf32>
    %132 = vector.multi_reduction <maximumf>, %131, %cst_73 [1] : vector<8x8xf32> to vector<8xf32>
    %133 = vector.shape_cast %132 : vector<8xf32> to vector<8x1xf32>
    %134 = vector.broadcast %133 : vector<8x1xf32> to vector<8x8xf32>
    %135 = arith.subf %131, %134 : vector<8x8xf32>
    %136 = math.exp %135 : vector<8x8xf32>
    %cst_74 = arith.constant dense<0.000000e+00> : vector<8xf32>
    %137 = vector.multi_reduction <add>, %136, %cst_74 [1] : vector<8x8xf32> to vector<8xf32>
    %138 = vector.shape_cast %137 : vector<8xf32> to vector<8x1xf32>
    %139 = vector.broadcast %138 : vector<8x1xf32> to vector<8x8xf32>
    %140 = arith.divf %136, %139 : vector<8x8xf32>
    %cst_75 = arith.constant dense<0.000000e+00> : vector<8x8xf32>
    %141 = tpu.matmul %140, %77, %cst_75 {dimension_numbers = #tpu.dot_dimension_numbers<[1], [0], [0], [1], [0, 0, 1, 1], [], []>} : vector<8x8xf32>, vector<8x8xf32>, vector<8x8xf32> -> vector<8x8xf32>
    %142 = vector.extract_strided_slice %79 {offsets = [24, 0], sizes = [8, 32], strides = [1, 1]} : vector<32x32xf32> to vector<8x32xf32>
    %cst_76 = arith.constant dense<0.000000e+00> : vector<8x32xf32>
    %143 = tpu.matmul %141, %142, %cst_76 {dimension_numbers = #tpu.dot_dimension_numbers<[1], [0], [0], [1], [0, 0, 1, 1], [], []>} : vector<8x8xf32>, vector<8x32xf32>, vector<8x32xf32> -> vector<8x32xf32>
    %144 = arith.addf %128, %143 : vector<8x32xf32>
    %145 = arith.addf %40, %144 : vector<8x32xf32>
    %c0_77 = arith.constant 0 : index
    %c0_78 = arith.constant 0 : index
    %c0_79 = arith.constant 0 : index
    %146 = vector.load %arg7[%c0_77, %c0_78, %c0_79] : memref<2x1x32xf32, #tpu.memory_space<vmem>>, vector<1x1x32xf32>
    %147 = vector.shape_cast %146 : vector<1x1x32xf32> to vector<1x32xf32>
    %148 = arith.mulf %145, %145 : vector<8x32xf32>
    %cst_80 = arith.constant dense<0.000000e+00> : vector<8xf32>
    %149 = vector.multi_reduction <add>, %148, %cst_80 [1] : vector<8x32xf32> to vector<8xf32>
    %150 = vector.shape_cast %149 : vector<8xf32> to vector<8x1xf32>
    %cst_81 = arith.constant 3.200000e+01 : f32
    %151 = vector.broadcast %cst_81 : f32 to vector<8x1xf32>
    %152 = arith.divf %150, %151 : vector<8x1xf32>
    %cst_82 = arith.constant 9.99999974E-6 : f32
    %153 = vector.broadcast %cst_82 : f32 to vector<8x1xf32>
    %154 = arith.addf %152, %153 : vector<8x1xf32>
    %155 = math.rsqrt %154 : vector<8x1xf32>
    %156 = vector.broadcast %155 : vector<8x1xf32> to vector<8x32xf32>
    %157 = arith.mulf %145, %156 : vector<8x32xf32>
    %158 = vector.broadcast %147 : vector<1x32xf32> to vector<8x32xf32>
    %159 = arith.mulf %158, %157 : vector<8x32xf32>
    %c0_83 = arith.constant 0 : index
    %c0_84 = arith.constant 0 : index
    %c0_85 = arith.constant 0 : index
    %160 = vector.load %arg4[%c0_83, %c0_84, %c0_85] : memref<2x32x128xf32, #tpu.memory_space<vmem>>, vector<1x32x128xf32>
    %161 = vector.shape_cast %160 : vector<1x32x128xf32> to vector<32x128xf32>
    %cst_86 = arith.constant dense<0.000000e+00> : vector<8x128xf32>
    %162 = tpu.matmul %159, %161, %cst_86 {dimension_numbers = #tpu.dot_dimension_numbers<[1], [0], [0], [1], [0, 0, 1, 1], [], []>} : vector<8x32xf32>, vector<32x128xf32>, vector<8x128xf32> -> vector<8x128xf32>
    %163 = vector.extract_strided_slice %162 {offsets = [0, 0], sizes = [8, 64], strides = [1, 1]} : vector<8x128xf32> to vector<8x64xf32>
    %164 = vector.extract_strided_slice %162 {offsets = [0, 64], sizes = [8, 64], strides = [1, 1]} : vector<8x128xf32> to vector<8x64xf32>
    %165 = arith.negf %163 : vector<8x64xf32>
    %166 = math.exp %165 : vector<8x64xf32>
    %cst_87 = arith.constant 1.000000e+00 : f32
    %167 = vector.broadcast %cst_87 : f32 to vector<8x64xf32>
    %168 = arith.addf %167, %166 : vector<8x64xf32>
    %169 = arith.divf %167, %168 : vector<8x64xf32>
    %170 = arith.mulf %163, %169 : vector<8x64xf32>
    %171 = arith.mulf %170, %164 : vector<8x64xf32>
    %c0_88 = arith.constant 0 : index
    %c0_89 = arith.constant 0 : index
    %c0_90 = arith.constant 0 : index
    %172 = vector.load %arg5[%c0_88, %c0_89, %c0_90] : memref<2x64x32xf32, #tpu.memory_space<vmem>>, vector<1x64x32xf32>
    %173 = vector.shape_cast %172 : vector<1x64x32xf32> to vector<64x32xf32>
    %cst_91 = arith.constant dense<0.000000e+00> : vector<8x32xf32>
    %174 = tpu.matmul %171, %173, %cst_91 {dimension_numbers = #tpu.dot_dimension_numbers<[1], [0], [0], [1], [0, 0, 1, 1], [], []>} : vector<8x64xf32>, vector<64x32xf32>, vector<8x32xf32> -> vector<8x32xf32>
    %175 = arith.addf %145, %174 : vector<8x32xf32>
    %c1_92 = arith.constant 1 : index
    %c0_93 = arith.constant 0 : index
    %c0_94 = arith.constant 0 : index
    %176 = vector.load %arg6[%c1_92, %c0_93, %c0_94] : memref<2x1x32xf32, #tpu.memory_space<vmem>>, vector<1x1x32xf32>
    %177 = vector.shape_cast %176 : vector<1x1x32xf32> to vector<1x32xf32>
    %178 = arith.mulf %175, %175 : vector<8x32xf32>
    %cst_95 = arith.constant dense<0.000000e+00> : vector<8xf32>
    %179 = vector.multi_reduction <add>, %178, %cst_95 [1] : vector<8x32xf32> to vector<8xf32>
    %180 = vector.shape_cast %179 : vector<8xf32> to vector<8x1xf32>
    %cst_96 = arith.constant 3.200000e+01 : f32
    %181 = vector.broadcast %cst_96 : f32 to vector<8x1xf32>
    %182 = arith.divf %180, %181 : vector<8x1xf32>
    %cst_97 = arith.constant 9.99999974E-6 : f32
    %183 = vector.broadcast %cst_97 : f32 to vector<8x1xf32>
    %184 = arith.addf %182, %183 : vector<8x1xf32>
    %185 = math.rsqrt %184 : vector<8x1xf32>
    %186 = vector.broadcast %185 : vector<8x1xf32> to vector<8x32xf32>
    %187 = arith.mulf %175, %186 : vector<8x32xf32>
    %188 = vector.broadcast %177 : vector<1x32xf32> to vector<8x32xf32>
    %189 = arith.mulf %188, %187 : vector<8x32xf32>
    %c1_98 = arith.constant 1 : index
    %c0_99 = arith.constant 0 : index
    %c0_100 = arith.constant 0 : index
    %190 = vector.load %arg2[%c1_98, %c0_99, %c0_100] : memref<2x32x128xf32, #tpu.memory_space<vmem>>, vector<1x32x128xf32>
    %191 = vector.shape_cast %190 : vector<1x32x128xf32> to vector<32x128xf32>
    %cst_101 = arith.constant dense<0.000000e+00> : vector<8x128xf32>
    %192 = tpu.matmul %189, %191, %cst_101 {dimension_numbers = #tpu.dot_dimension_numbers<[1], [0], [0], [1], [0, 0, 1, 1], [], []>} : vector<8x32xf32>, vector<32x128xf32>, vector<8x128xf32> -> vector<8x128xf32>
    %193 = vector.extract_strided_slice %192 {offsets = [0, 0], sizes = [8, 32], strides = [1, 1]} : vector<8x128xf32> to vector<8x32xf32>
    %194 = vector.extract_strided_slice %192 {offsets = [0, 32], sizes = [8, 16], strides = [1, 1]} : vector<8x128xf32> to vector<8x16xf32>
    %195 = vector.extract_strided_slice %192 {offsets = [0, 48], sizes = [8, 16], strides = [1, 1]} : vector<8x128xf32> to vector<8x16xf32>
    %196 = vector.extract_strided_slice %192 {offsets = [0, 64], sizes = [8, 32], strides = [1, 1]} : vector<8x128xf32> to vector<8x32xf32>
    %197 = vector.extract_strided_slice %192 {offsets = [0, 96], sizes = [8, 16], strides = [1, 1]} : vector<8x128xf32> to vector<8x16xf32>
    %198 = arith.mulf %193, %42 : vector<8x32xf32>
    %199 = arith.mulf %196, %43 : vector<8x32xf32>
    %200 = arith.addf %198, %199 : vector<8x32xf32>
    %201 = arith.mulf %194, %44 : vector<8x16xf32>
    %202 = arith.mulf %197, %45 : vector<8x16xf32>
    %203 = arith.addf %201, %202 : vector<8x16xf32>
    %204 = vector.extract_strided_slice %203 {offsets = [0, 0], sizes = [8, 8], strides = [1, 1]} : vector<8x16xf32> to vector<8x8xf32>
    %205 = vector.extract_strided_slice %203 {offsets = [0, 8], sizes = [8, 8], strides = [1, 1]} : vector<8x16xf32> to vector<8x8xf32>
    %206 = vector.extract_strided_slice %195 {offsets = [0, 0], sizes = [8, 8], strides = [1, 1]} : vector<8x16xf32> to vector<8x8xf32>
    %207 = vector.extract_strided_slice %195 {offsets = [0, 8], sizes = [8, 8], strides = [1, 1]} : vector<8x16xf32> to vector<8x8xf32>
    %c1_102 = arith.constant 1 : index
    %c0_103 = arith.constant 0 : index
    %c0_104 = arith.constant 0 : index
    %208 = vector.load %arg3[%c1_102, %c0_103, %c0_104] : memref<2x32x32xf32, #tpu.memory_space<vmem>>, vector<1x32x32xf32>
    %209 = vector.shape_cast %208 : vector<1x32x32xf32> to vector<32x32xf32>
    %cst_105 = arith.constant 0.000000e+00 : f32
    %210 = vector.broadcast %cst_105 : f32 to vector<8x32xf32>
    %211 = vector.extract_strided_slice %200 {offsets = [0, 0], sizes = [8, 8], strides = [1, 1]} : vector<8x32xf32> to vector<8x8xf32>
    %cst_106 = arith.constant dense<0.000000e+00> : vector<8x8xf32>
    %212 = tpu.matmul %211, %204, %cst_106 {dimension_numbers = #tpu.dot_dimension_numbers<[1], [1], [0], [0], [0, 0, 1, 0], [], []>} : vector<8x8xf32>, vector<8x8xf32>, vector<8x8xf32> -> vector<8x8xf32>
    %213 = arith.addf %212, %41 : vector<8x8xf32>
    %cst_107 = arith.constant dense<0xFF800000> : vector<8xf32>
    %214 = vector.multi_reduction <maximumf>, %213, %cst_107 [1] : vector<8x8xf32> to vector<8xf32>
    %215 = vector.shape_cast %214 : vector<8xf32> to vector<8x1xf32>
    %216 = vector.broadcast %215 : vector<8x1xf32> to vector<8x8xf32>
    %217 = arith.subf %213, %216 : vector<8x8xf32>
    %218 = math.exp %217 : vector<8x8xf32>
    %cst_108 = arith.constant dense<0.000000e+00> : vector<8xf32>
    %219 = vector.multi_reduction <add>, %218, %cst_108 [1] : vector<8x8xf32> to vector<8xf32>
    %220 = vector.shape_cast %219 : vector<8xf32> to vector<8x1xf32>
    %221 = vector.broadcast %220 : vector<8x1xf32> to vector<8x8xf32>
    %222 = arith.divf %218, %221 : vector<8x8xf32>
    %cst_109 = arith.constant dense<0.000000e+00> : vector<8x8xf32>
    %223 = tpu.matmul %222, %206, %cst_109 {dimension_numbers = #tpu.dot_dimension_numbers<[1], [0], [0], [1], [0, 0, 1, 1], [], []>} : vector<8x8xf32>, vector<8x8xf32>, vector<8x8xf32> -> vector<8x8xf32>
    %224 = vector.extract_strided_slice %209 {offsets = [0, 0], sizes = [8, 32], strides = [1, 1]} : vector<32x32xf32> to vector<8x32xf32>
    %cst_110 = arith.constant dense<0.000000e+00> : vector<8x32xf32>
    %225 = tpu.matmul %223, %224, %cst_110 {dimension_numbers = #tpu.dot_dimension_numbers<[1], [0], [0], [1], [0, 0, 1, 1], [], []>} : vector<8x8xf32>, vector<8x32xf32>, vector<8x32xf32> -> vector<8x32xf32>
    %226 = arith.addf %210, %225 : vector<8x32xf32>
    %227 = vector.extract_strided_slice %200 {offsets = [0, 8], sizes = [8, 8], strides = [1, 1]} : vector<8x32xf32> to vector<8x8xf32>
    %cst_111 = arith.constant dense<0.000000e+00> : vector<8x8xf32>
    %228 = tpu.matmul %227, %204, %cst_111 {dimension_numbers = #tpu.dot_dimension_numbers<[1], [1], [0], [0], [0, 0, 1, 0], [], []>} : vector<8x8xf32>, vector<8x8xf32>, vector<8x8xf32> -> vector<8x8xf32>
    %229 = arith.addf %228, %41 : vector<8x8xf32>
    %cst_112 = arith.constant dense<0xFF800000> : vector<8xf32>
    %230 = vector.multi_reduction <maximumf>, %229, %cst_112 [1] : vector<8x8xf32> to vector<8xf32>
    %231 = vector.shape_cast %230 : vector<8xf32> to vector<8x1xf32>
    %232 = vector.broadcast %231 : vector<8x1xf32> to vector<8x8xf32>
    %233 = arith.subf %229, %232 : vector<8x8xf32>
    %234 = math.exp %233 : vector<8x8xf32>
    %cst_113 = arith.constant dense<0.000000e+00> : vector<8xf32>
    %235 = vector.multi_reduction <add>, %234, %cst_113 [1] : vector<8x8xf32> to vector<8xf32>
    %236 = vector.shape_cast %235 : vector<8xf32> to vector<8x1xf32>
    %237 = vector.broadcast %236 : vector<8x1xf32> to vector<8x8xf32>
    %238 = arith.divf %234, %237 : vector<8x8xf32>
    %cst_114 = arith.constant dense<0.000000e+00> : vector<8x8xf32>
    %239 = tpu.matmul %238, %206, %cst_114 {dimension_numbers = #tpu.dot_dimension_numbers<[1], [0], [0], [1], [0, 0, 1, 1], [], []>} : vector<8x8xf32>, vector<8x8xf32>, vector<8x8xf32> -> vector<8x8xf32>
    %240 = vector.extract_strided_slice %209 {offsets = [8, 0], sizes = [8, 32], strides = [1, 1]} : vector<32x32xf32> to vector<8x32xf32>
    %cst_115 = arith.constant dense<0.000000e+00> : vector<8x32xf32>
    %241 = tpu.matmul %239, %240, %cst_115 {dimension_numbers = #tpu.dot_dimension_numbers<[1], [0], [0], [1], [0, 0, 1, 1], [], []>} : vector<8x8xf32>, vector<8x32xf32>, vector<8x32xf32> -> vector<8x32xf32>
    %242 = arith.addf %226, %241 : vector<8x32xf32>
    %243 = vector.extract_strided_slice %200 {offsets = [0, 16], sizes = [8, 8], strides = [1, 1]} : vector<8x32xf32> to vector<8x8xf32>
    %cst_116 = arith.constant dense<0.000000e+00> : vector<8x8xf32>
    %244 = tpu.matmul %243, %205, %cst_116 {dimension_numbers = #tpu.dot_dimension_numbers<[1], [1], [0], [0], [0, 0, 1, 0], [], []>} : vector<8x8xf32>, vector<8x8xf32>, vector<8x8xf32> -> vector<8x8xf32>
    %245 = arith.addf %244, %41 : vector<8x8xf32>
    %cst_117 = arith.constant dense<0xFF800000> : vector<8xf32>
    %246 = vector.multi_reduction <maximumf>, %245, %cst_117 [1] : vector<8x8xf32> to vector<8xf32>
    %247 = vector.shape_cast %246 : vector<8xf32> to vector<8x1xf32>
    %248 = vector.broadcast %247 : vector<8x1xf32> to vector<8x8xf32>
    %249 = arith.subf %245, %248 : vector<8x8xf32>
    %250 = math.exp %249 : vector<8x8xf32>
    %cst_118 = arith.constant dense<0.000000e+00> : vector<8xf32>
    %251 = vector.multi_reduction <add>, %250, %cst_118 [1] : vector<8x8xf32> to vector<8xf32>
    %252 = vector.shape_cast %251 : vector<8xf32> to vector<8x1xf32>
    %253 = vector.broadcast %252 : vector<8x1xf32> to vector<8x8xf32>
    %254 = arith.divf %250, %253 : vector<8x8xf32>
    %cst_119 = arith.constant dense<0.000000e+00> : vector<8x8xf32>
    %255 = tpu.matmul %254, %207, %cst_119 {dimension_numbers = #tpu.dot_dimension_numbers<[1], [0], [0], [1], [0, 0, 1, 1], [], []>} : vector<8x8xf32>, vector<8x8xf32>, vector<8x8xf32> -> vector<8x8xf32>
    %256 = vector.extract_strided_slice %209 {offsets = [16, 0], sizes = [8, 32], strides = [1, 1]} : vector<32x32xf32> to vector<8x32xf32>
    %cst_120 = arith.constant dense<0.000000e+00> : vector<8x32xf32>
    %257 = tpu.matmul %255, %256, %cst_120 {dimension_numbers = #tpu.dot_dimension_numbers<[1], [0], [0], [1], [0, 0, 1, 1], [], []>} : vector<8x8xf32>, vector<8x32xf32>, vector<8x32xf32> -> vector<8x32xf32>
    %258 = arith.addf %242, %257 : vector<8x32xf32>
    %259 = vector.extract_strided_slice %200 {offsets = [0, 24], sizes = [8, 8], strides = [1, 1]} : vector<8x32xf32> to vector<8x8xf32>
    %cst_121 = arith.constant dense<0.000000e+00> : vector<8x8xf32>
    %260 = tpu.matmul %259, %205, %cst_121 {dimension_numbers = #tpu.dot_dimension_numbers<[1], [1], [0], [0], [0, 0, 1, 0], [], []>} : vector<8x8xf32>, vector<8x8xf32>, vector<8x8xf32> -> vector<8x8xf32>
    %261 = arith.addf %260, %41 : vector<8x8xf32>
    %cst_122 = arith.constant dense<0xFF800000> : vector<8xf32>
    %262 = vector.multi_reduction <maximumf>, %261, %cst_122 [1] : vector<8x8xf32> to vector<8xf32>
    %263 = vector.shape_cast %262 : vector<8xf32> to vector<8x1xf32>
    %264 = vector.broadcast %263 : vector<8x1xf32> to vector<8x8xf32>
    %265 = arith.subf %261, %264 : vector<8x8xf32>
    %266 = math.exp %265 : vector<8x8xf32>
    %cst_123 = arith.constant dense<0.000000e+00> : vector<8xf32>
    %267 = vector.multi_reduction <add>, %266, %cst_123 [1] : vector<8x8xf32> to vector<8xf32>
    %268 = vector.shape_cast %267 : vector<8xf32> to vector<8x1xf32>
    %269 = vector.broadcast %268 : vector<8x1xf32> to vector<8x8xf32>
    %270 = arith.divf %266, %269 : vector<8x8xf32>
    %cst_124 = arith.constant dense<0.000000e+00> : vector<8x8xf32>
    %271 = tpu.matmul %270, %207, %cst_124 {dimension_numbers = #tpu.dot_dimension_numbers<[1], [0], [0], [1], [0, 0, 1, 1], [], []>} : vector<8x8xf32>, vector<8x8xf32>, vector<8x8xf32> -> vector<8x8xf32>
    %272 = vector.extract_strided_slice %209 {offsets = [24, 0], sizes = [8, 32], strides = [1, 1]} : vector<32x32xf32> to vector<8x32xf32>
    %cst_125 = arith.constant dense<0.000000e+00> : vector<8x32xf32>
    %273 = tpu.matmul %271, %272, %cst_125 {dimension_numbers = #tpu.dot_dimension_numbers<[1], [0], [0], [1], [0, 0, 1, 1], [], []>} : vector<8x8xf32>, vector<8x32xf32>, vector<8x32xf32> -> vector<8x32xf32>
    %274 = arith.addf %258, %273 : vector<8x32xf32>
    %275 = arith.addf %175, %274 : vector<8x32xf32>
    %c1_126 = arith.constant 1 : index
    %c0_127 = arith.constant 0 : index
    %c0_128 = arith.constant 0 : index
    %276 = vector.load %arg7[%c1_126, %c0_127, %c0_128] : memref<2x1x32xf32, #tpu.memory_space<vmem>>, vector<1x1x32xf32>
    %277 = vector.shape_cast %276 : vector<1x1x32xf32> to vector<1x32xf32>
    %278 = arith.mulf %275, %275 : vector<8x32xf32>
    %cst_129 = arith.constant dense<0.000000e+00> : vector<8xf32>
    %279 = vector.multi_reduction <add>, %278, %cst_129 [1] : vector<8x32xf32> to vector<8xf32>
    %280 = vector.shape_cast %279 : vector<8xf32> to vector<8x1xf32>
    %cst_130 = arith.constant 3.200000e+01 : f32
    %281 = vector.broadcast %cst_130 : f32 to vector<8x1xf32>
    %282 = arith.divf %280, %281 : vector<8x1xf32>
    %cst_131 = arith.constant 9.99999974E-6 : f32
    %283 = vector.broadcast %cst_131 : f32 to vector<8x1xf32>
    %284 = arith.addf %282, %283 : vector<8x1xf32>
    %285 = math.rsqrt %284 : vector<8x1xf32>
    %286 = vector.broadcast %285 : vector<8x1xf32> to vector<8x32xf32>
    %287 = arith.mulf %275, %286 : vector<8x32xf32>
    %288 = vector.broadcast %277 : vector<1x32xf32> to vector<8x32xf32>
    %289 = arith.mulf %288, %287 : vector<8x32xf32>
    %c1_132 = arith.constant 1 : index
    %c0_133 = arith.constant 0 : index
    %c0_134 = arith.constant 0 : index
    %290 = vector.load %arg4[%c1_132, %c0_133, %c0_134] : memref<2x32x128xf32, #tpu.memory_space<vmem>>, vector<1x32x128xf32>
    %291 = vector.shape_cast %290 : vector<1x32x128xf32> to vector<32x128xf32>
    %cst_135 = arith.constant dense<0.000000e+00> : vector<8x128xf32>
    %292 = tpu.matmul %289, %291, %cst_135 {dimension_numbers = #tpu.dot_dimension_numbers<[1], [0], [0], [1], [0, 0, 1, 1], [], []>} : vector<8x32xf32>, vector<32x128xf32>, vector<8x128xf32> -> vector<8x128xf32>
    %293 = vector.extract_strided_slice %292 {offsets = [0, 0], sizes = [8, 64], strides = [1, 1]} : vector<8x128xf32> to vector<8x64xf32>
    %294 = vector.extract_strided_slice %292 {offsets = [0, 64], sizes = [8, 64], strides = [1, 1]} : vector<8x128xf32> to vector<8x64xf32>
    %295 = arith.negf %293 : vector<8x64xf32>
    %296 = math.exp %295 : vector<8x64xf32>
    %cst_136 = arith.constant 1.000000e+00 : f32
    %297 = vector.broadcast %cst_136 : f32 to vector<8x64xf32>
    %298 = arith.addf %297, %296 : vector<8x64xf32>
    %299 = arith.divf %297, %298 : vector<8x64xf32>
    %300 = arith.mulf %293, %299 : vector<8x64xf32>
    %301 = arith.mulf %300, %294 : vector<8x64xf32>
    %c1_137 = arith.constant 1 : index
    %c0_138 = arith.constant 0 : index
    %c0_139 = arith.constant 0 : index
    %302 = vector.load %arg5[%c1_137, %c0_138, %c0_139] : memref<2x64x32xf32, #tpu.memory_space<vmem>>, vector<1x64x32xf32>
    %303 = vector.shape_cast %302 : vector<1x64x32xf32> to vector<64x32xf32>
    %cst_140 = arith.constant dense<0.000000e+00> : vector<8x32xf32>
    %304 = tpu.matmul %301, %303, %cst_140 {dimension_numbers = #tpu.dot_dimension_numbers<[1], [0], [0], [1], [0, 0, 1, 1], [], []>} : vector<8x64xf32>, vector<64x32xf32>, vector<8x32xf32> -> vector<8x32xf32>
    %305 = arith.addf %275, %304 : vector<8x32xf32>
    %306 = vector.extract_strided_slice %305 {offsets = [7, 0], sizes = [1, 32], strides = [1, 1]} : vector<8x32xf32> to vector<1x32xf32>
    %c0_141 = arith.constant 0 : index
    %c0_142 = arith.constant 0 : index
    %307 = vector.load %arg13[%c0_141, %c0_142] : memref<1x32xf32, #tpu.memory_space<vmem>>, vector<1x32xf32>
    %308 = arith.mulf %306, %306 : vector<1x32xf32>
    %cst_143 = arith.constant dense<0.000000e+00> : vector<1xf32>
    %309 = vector.multi_reduction <add>, %308, %cst_143 [1] : vector<1x32xf32> to vector<1xf32>
    %310 = vector.shape_cast %309 : vector<1xf32> to vector<1x1xf32>
    %cst_144 = arith.constant 3.200000e+01 : f32
    %311 = vector.broadcast %cst_144 : f32 to vector<1x1xf32>
    %312 = arith.divf %310, %311 : vector<1x1xf32>
    %cst_145 = arith.constant 9.99999974E-6 : f32
    %313 = vector.broadcast %cst_145 : f32 to vector<1x1xf32>
    %314 = arith.addf %312, %313 : vector<1x1xf32>
    %315 = math.rsqrt %314 : vector<1x1xf32>
    %316 = vector.broadcast %315 : vector<1x1xf32> to vector<1x32xf32>
    %317 = arith.mulf %306, %316 : vector<1x32xf32>
    %318 = arith.mulf %307, %317 : vector<1x32xf32>
    %c0_146 = arith.constant 0 : index
    %c0_147 = arith.constant 0 : index
    %319 = vector.load %arg14[%c0_146, %c0_147] : memref<32x64xf32, #tpu.memory_space<vmem>>, vector<32x64xf32>
    %cst_148 = arith.constant dense<0.000000e+00> : vector<1x64xf32>
    %320 = tpu.matmul %318, %319, %cst_148 {dimension_numbers = #tpu.dot_dimension_numbers<[1], [0], [0], [1], [0, 0, 1, 1], [], []>} : vector<1x32xf32>, vector<32x64xf32>, vector<1x64xf32> -> vector<1x64xf32>
    %cst_149 = arith.constant dense<0xFF800000> : vector<1xf32>
    %321 = vector.multi_reduction <maximumf>, %320, %cst_149 [1] : vector<1x64xf32> to vector<1xf32>
    %322 = vector.shape_cast %321 : vector<1xf32> to vector<1x1xf32>
    %323 = tpu.iota {dimensions = array<i32: 1>} : vector<1x64xi32>
    %324 = vector.broadcast %322 : vector<1x1xf32> to vector<1x64xf32>
    %325 = arith.cmpf oeq, %320, %324 : vector<1x64xf32>
    %c64_i32 = arith.constant 64 : i32
    %326 = vector.broadcast %c64_i32 : i32 to vector<1x64xi32>
    %327 = arith.select %325, %323, %326 : vector<1x64xi1>, vector<1x64xi32>
    %cst_150 = arith.constant dense<2147483647> : vector<1xi32>
    %328 = vector.multi_reduction <minsi>, %327, %cst_150 [1] : vector<1x64xi32> to vector<1xi32>
    %329 = vector.shape_cast %328 : vector<1xi32> to vector<1x1xi32>
    %c0_151 = arith.constant 0 : index
    %c0_152 = arith.constant 0 : index
    %330 = vector.load %arg15[%c0_151, %c0_152] : memref<1x1xi32, #tpu.memory_space<vmem>>, vector<1x1xi32>
    tpu.vector_store %arg15[%c0_151, %c0_152], %329 {strides = array<i32>} : memref<1x1xi32, #tpu.memory_space<vmem>>, vector<1x1xi32>,
    return
  }
}

</mosaic_0001>

<bundles_post_ra>
// kernel: llama_forward.1
= control target key start
LH: loop header
LB: loop body
LE: loop exit
PB: predicated region body
PF: predicated region fallthrough
CT: control target
= control target key end

     0   :  { %s3946_s0 = inlined_call_operand.vmem [shape: s32[8], index: 0, kind: input, shape index: {}]   ;;  %s3947_s1 = inlined_call_operand.vmem [shape: f32[64,1,32], index: 1, kind: input, shape index: {}]   ;;  %s3948_s2 = inlined_call_operand.vmem [shape: f32[2,32,128], index: 2, kind: input, shape index: {}]   ;;  %s3949_s3 = inlined_call_operand.vmem [shape: f32[2,32,32], index: 3, kind: input, shape index: {}]   ;;  %s3950_s4 = inlined_call_operand.vmem [shape: f32[2,32,128], index: 4, kind: input, shape index: {}]   ;;  %s3951_s5 = inlined_call_operand.vmem [shape: f32[2,64,32], index: 5, kind: input, shape index: {}]   ;;  %s3952_s6 = inlined_call_operand.vmem [shape: f32[2,1,32], index: 6, kind: input, shape index: {}]   ;;  %s3953_s7 = inlined_call_operand.vmem [shape: f32[2,1,32], index: 7, kind: input, shape index: {}]   ;;  %s3954_s8 = inlined_call_operand.vmem [shape: f32[8,32], index: 8, kind: input, shape index: {}]   ;;  %s3955_s9 = inlined_call_operand.vmem [shape: f32[8,32], index: 9, kind: input, shape index: {}]   ;;  %s3956_s10 = inlined_call_operand.vmem [shape: f32[8,16], index: 10, kind: input, shape index: {}]   ;;  %s3957_s11 = inlined_call_operand.hbm [shape: f32[8,16], index: 11, kind: input, shape index: {}]   ;;  %s3958_s12 = inlined_call_operand.hbm [shape: f32[8,8], index: 12, kind: input, shape index: {}]   ;;  %s3959_s13 = inlined_call_operand.vmem [shape: f32[1,32], index: 13, kind: input, shape index: {}]   ;;  %s3960_s14 = inlined_call_operand.vmem [shape: f32[32,64], index: 14, kind: input, shape index: {}]   ;;  %s3961_s15 = inlined_call_operand.hbm [shape: s32[1,1], index: 15, kind: output, shape index: {}]  }
   0x1   :  { %3963 = sst [smem:[#allocation15_spill]] %s3959_s13 }
   0x2   :  { %3964 = sst [smem:[#allocation16_spill]] %s3961_s15 }
   0x3   :  { %20 = vsyncpa [#allocation6], 0 }
   0x4   :  { %21 = vsyncpa [#allocation4], 0 }
   0x5   :  { %22 = vsyncpa [#allocation9], 0 }
   0x6   :  { %23 = vsyncpa [#allocation5], 0  ;;  %s30_s20 = sshll.u32 %s3946_s0, 4  ;;  %s31_s20 = int_to_ptr.vmem [resolvable:$true] %s30_s20 }
   0x7   :  { %s3285_s21 = scalar_lea.vmem %s31_s20, 16  ;;  %p3290_p1 = scmp.lt.s32.totalorder %s31_s20, %s31_s20 }
   0x8   :  { %p3286_p0 = scmp.ne.s32.totalorder %s31_s20, %s3285_s21  ;;  %p3291_p2 = scmp.lt.s32.totalorder %s3285_s21, %s3285_s21 }
   0xa   :  { %p3292_p3 = por %p3291_p2, %p3290_p1 }
   0xc   :  { %p3293_p4 = pnand %p3292_p3, %p3286_p0 }
   0xe   :  { %3296 = shalt.err (!%p3293_p4)
}
   0xf   :  { %s3371_s22 = smov [#allocation3]   ;;  %s3372_s23 = smov [#allocation7]  }
  0x10   :  { %33 = dma.vmem_to_smem %s31_s20, 16, %s3371_s22, [#allocation6]  }
  0x11   :  { %s60_s24 = sshll.u32 %s3372_s23, 4  ;;  %s3373_s25 = smov [#allocation8]   ;;  %s61_s24 = int_to_ptr.vmem [resolvable:$true] %s60_s24 }
  0x12   :  { %s70_s26 = sshll.u32 %s3373_s25, 4  ;;  %s3297_s29 = scalar_lea.hbm %s3957_s11, 128  ;;  %s71_s26 = int_to_ptr.vmem [resolvable:$true] %s70_s26 }
  0x13   :  { %p3298_p5 = scmp.ne.s32.totalorder %s3957_s11, %s3297_s29  ;;  %p3301_p6 = scmp.lt.u32.totalorder %s3297_s29, %s3957_s11 }
  0x15   :  { %p3303_p7 = pnand %p3301_p6, %p3298_p5 }
  0x17   :  { %3306 = shalt.err (!%p3303_p7)
}
  0x18   :  { %s3307_s18 = scalar_lea.vmem %s61_s24, 128  ;;  %p3312_p9 = scmp.lt.s32.totalorder %s61_s24, %s61_s24 }
  0x19   :  { %p3308_p8 = scmp.ne.s32.totalorder %s61_s24, %s3307_s18  ;;  %p3313_p10 = scmp.lt.s32.totalorder %s3307_s18, %s3307_s18 }
  0x1b   :  { %p3314_p11 = por %p3313_p10, %p3312_p9 }
  0x1d   :  { %p3315_p12 = pnand %p3314_p11, %p3308_p8 }
  0x1f   :  { %3318 = shalt.err (!%p3315_p12)
}
  0x20   :  { %63 = dma.hbm_to_vmem [thread:$0]  %s3957_s11, 128, %s61_s24, [#allocation4]  }
  0x21   :  { %s3319_s23 = scalar_lea.hbm %s3958_s12, 128 }
  0x22   :  { %p3320_p13 = scmp.ne.s32.totalorder %s3958_s12, %s3319_s23  ;;  %p3323_p0 = scmp.lt.u32.totalorder %s3319_s23, %s3958_s12 }
  0x24   :  { %p3325_p1 = pnand %p3323_p0, %p3320_p13 }
  0x26   :  { %3328 = shalt.err (!%p3325_p1)
}
  0x27   :  { %s3329_s0 = scalar_lea.vmem %s71_s26, 128  ;;  %p3334_p3 = scmp.lt.s32.totalorder %s71_s26, %s71_s26 }
  0x28   :  { %p3330_p2 = scmp.ne.s32.totalorder %s71_s26, %s3329_s0  ;;  %p3335_p4 = scmp.lt.s32.totalorder %s3329_s0, %s3329_s0 }
  0x2a   :  { %p3336_p5 = por %p3335_p4, %p3334_p3 }
  0x2c   :  { %p3337_p6 = pnand %p3336_p5, %p3330_p2 }
  0x2e   :  { %3340 = shalt.err (!%p3337_p6)
}
  0x2f   :  { %73 = dma.hbm_to_vmem [thread:$0]  %s3958_s12, 128, %s71_s26, [#allocation9]  }
  0x30   :  { %3363 = dma.done.wait [#allocation6], 16  }
  0x31   :  { %3364 = vsyncadd [#allocation6], 4294967280 }
  0x32   :  { %3365 = dma.done.wait [#allocation4], 128  }
  0x33   :  { %3366 = vsyncadd [#allocation4], 4294967168 }
  0x34   :  { %3367 = dma.done.wait [#allocation9], 128  }
  0x35   :  { %3368 = vsyncadd [#allocation9], 4294967168 }
  0x36   :  { %87 = sfence }
  0x37   :  { %s88_s30 = sld [smem:[#allocation3]]  ;;  %s2786_s16 = sld [smem:[#allocation3 + $0x1]]  ;;  %vm91_vm0 = vcmask 253952   ;;  %vm129_vm1 = vcmask 261120   ;;  %v145_v11 = vld [vmem:[%s3948_s2] sm:$0xff]  ;;  %v146_v12 = vld [vmem:[%s3948_s2 + $0x8] sm:$0xff] }
  0x38   :  { %s2787_s17 = sld [smem:[#allocation3 + $0x2]]  ;;  %s2788_s18 = sld [smem:[#allocation3 + $0x3]]  ;;  %v147_v13 = vld [vmem:[%s3948_s2 + $0x10] sm:$0xff]  ;;  %v3374_v14 = vmov 0.0|0.0   ;;  %v3165_v15 = vpack.c.bf16 %v146_v12, %v145_v11  ;;  %v148_v16 = vld [vmem:[%s3948_s2 + $0x18] sm:$0xff]  ;;  %vm3375_vm2 = vmmov 0  }
  0x39   :  { %s2789_s19 = sld [smem:[#allocation3 + $0x4]]  ;;  %s2790_s20 = sld [smem:[#allocation3 + $0x5]]  ;;  %3164 = vmatprep.subr.bf16.mxu0 %v3374_v14  ;;  %v3376_v17 = vmov 0.0   ;;  %v3168_v18 = vpack.c.bf16 %v148_v16, %v147_v13  ;;  %v124_v19 = vld [vmem:[%s3955_s9] sm:$0xff]  ;;  %v126_v20 = vld [vmem:[#allocation7] sm:$0xff]  ;;  %vm255_vm3 = vcmask 64512  }
  0x3a   :  { %s2791_s21 = sld [smem:[#allocation3 + $0x6]]  ;;  %s2792_s22 = sld [smem:[#allocation3 + $0x7]]  ;;  %2959 = vmatprep.mubr.msk.f32.mxu0 %vm3375_vm2, %v3376_v17  ;;  %2962 = vmatprep.subr.mxu1 %v3376_v17  ;;  %v125_v21 = vld [vmem:[%s3956_s10] sm:$0xff]  ;;  %v3606_v45 = vld [vmem:[#allocation8] sm:$0xff]  ;;  %vm1308_vm4 = vcmask 523264   ;;  %vm2631_vm5 = vcmask 261127  }
  0x3b   :  { %2964 = vmatprep.mubr.msk.f32.mxu1 %vm3375_vm2, %v3376_v17  ;;  %3166 = vmatpush3.bf16.msra.mxu0 %v3165_v15  ;;  %s3377_s23 = smov 64   ;;  %v2793_v26 = vld [vmem:[%s3952_s6] ss:$0 sm:$0xff]  ;;  %s3382_s27 = smov 112   ;;  %vm2736_vm6 = vcmask 516096   ;;  %vm2759_vm9 = vcmask 0  }
  0x3c   :  { %3167 = vmatprep.subr.bf16.mxu0 %v3374_v14  ;;  %224 = vrot.lane.b32.xlu1 %v124_v19, %s3377_s23  ;;  %v3586_v38 = vld [vmem:[%s3954_s8] sm:$0xff]  ;;  %s3381_s8 = smov 88  }
  0x3d   :  { %s89_s12 = scalar_lea.vmem %s3947_s1, %s88_s30  ;;  %s94_s28 = scalar_lea.vmem %s3947_s1, %s2786_s16 }
  0x3e   :  { %v90_v0 = vld [vmem:[%s89_s12] sm:$0x1]  ;;  %s98_s11 = scalar_lea.vmem %s3947_s1, %s2787_s17  ;;  %s102_s13 = scalar_lea.vmem %s3947_s1, %s2788_s18 }
  0x3f   :  { %v95_v1 = vld [vmem:[%s94_s28] sm:$0x1]  ;;  %92 = vst.msk [vmem:[#allocation2] sm:$0x1] %vm91_vm0, %v90_v0  ;;  %s106_s16 = scalar_lea.vmem %s3947_s1, %s2789_s19  ;;  %s110_s26 = scalar_lea.vmem %s3947_s1, %s2790_s20  ;;  %3169 = vmatpush3.bf16.msra.mxu0 %v3168_v18  ;;  %v249_v0 = vld [vmem:[%s3949_s3 + $0x8] sm:$0xff] }
  0x40   :  { %96 = vst.msk [vmem:[#allocation2 + $0x1] sm:$0x1] %vm91_vm0, %v95_v1  ;;  %v99_v2 = vld [vmem:[%s98_s11] sm:$0x1]  ;;  %s114_s18 = scalar_lea.vmem %s3947_s1, %s2791_s21  ;;  %s118_s28 = scalar_lea.vmem %s3947_s1, %s2792_s22  ;;  %2972 = vmatprep.subr.mxu0 %v3376_v17 }
  0x41   :  { %v103_v3 = vld [vmem:[%s102_s13] sm:$0x1]  ;;  %100 = vst.msk [vmem:[#allocation2 + $0x2] sm:$0x1] %vm91_vm0, %v99_v2  ;;  %s3378_s12 = smov 96   ;;  %s3383_s13 = smov 80  }
  0x42   :  { %104 = vst.msk [vmem:[#allocation2 + $0x3] sm:$0x1] %vm91_vm0, %v103_v3  ;;  %v107_v4 = vld [vmem:[%s106_s16] sm:$0x1]  ;;  %s3384_s21 = smov 72   ;;  %s3385_s22 = smov 104  }
  0x43   :  { %v111_v5 = vld [vmem:[%s110_s26] sm:$0x1]  ;;  %108 = vst.msk [vmem:[#allocation2 + $0x4] sm:$0x1] %vm91_vm0, %v107_v4  ;;  %s3379_s26 = smov 32   ;;  %s3965_s17 = sld [smem:[#allocation15_spill]] }
  0x44   :  { %112 = vst.msk [vmem:[#allocation2 + $0x5] sm:$0x1] %vm91_vm0, %v111_v5  ;;  %v115_v6 = vld [vmem:[%s114_s18] sm:$0x1]  ;;  %234 = vrot.lane.b32.xlu1 %v125_v21, %s3379_s26  ;;  %s3380_s18 = smov 120  }
  0x45   :  { %v119_v7 = vld [vmem:[%s118_s28] sm:$0x1]  ;;  %116 = vst.msk [vmem:[#allocation2 + $0x6] sm:$0x1] %vm91_vm0, %v115_v6  ;;  %s3387_s28 = smov [#allocation10]  }
  0x46   :  { %120 = vst.msk [vmem:[#allocation2 + $0x7] sm:$0x1] %vm91_vm0, %v119_v7  ;;  %s2767_s1 = sshll.u32 %s3387_s28, 4  ;;  %s2768_s1 = int_to_ptr.vmem [resolvable:$true] %s2767_s1 }
  0x47   :  { %s3341_s19 = scalar_lea.vmem %s2768_s1, 16  ;;  %s3345_s20 = scalar_lea.vmem %s2768_s1, 32 }
  0x48   :  { %p3342_p7 = scmp.ne.s32.totalorder %s2768_s1, %s3341_s19  ;;  %p3346_p8 = scmp.lt.s32.totalorder %s2768_s1, %s2768_s1 }
  0x49   :  { %p3347_p9 = scmp.lt.s32.totalorder %s3345_s20, %s3341_s19 }
  0x4b   :  { %p3348_p10 = por %p3347_p9, %p3346_p8 }
  0x4d   :  { %v3527_v8 = vld [vmem:[#allocation2] sm:$0xff]  ;;  %p3349_p11 = pnand %p3348_p10, %p3342_p7 }
  0x4e   :  { %v128_v9 = vmul.f32 %v3527_v8, %v3527_v8 }
  0x50   :  { %v130_v10 = vsel %vm129_vm1, %v128_v9, 0.0  ;;  %v248_v9 = vld [vmem:[%s3949_s3] sm:$0xff] }
  0x51   :  { %131 = vadd.xlane.f32.xlu0 %v130_v10 }
  0x67   :  { %239 = vrot.lane.b32.xlu0 %v126_v20, %s3378_s12 }
  0xae   :  { %v3574_v33 = vpop.permute.xlu1 %224 }
  0xb6   :  { %v3579_v35 = vpop.permute.xlu1 %234 }
  0xde   :  { %v132_v22 = vpop.xlane.xlu0 %131 }
  0xdf   :  { %v134_v23 = vmul.f32 0.03125, %v132_v22 }
  0xe1   :  { %v135_v24 = vadd.f32 1e-05, %v134_v23 }
  0xe2   :  { %v3567_v29 = vpop.permute.xlu0 %239 }
  0xe3   :  { %3235 = vrsqrt.f32 %v135_v24 }
  0xed   :  { %v3236_v25 = vpop.eup %3235 }
  0xee   :  { %v137_v27 = vmul.f32 %v3236_v25, %v3527_v8 }
  0xf0   :  { %v144_v28 = vmul.f32 %v2793_v26, %v137_v27 }
  0xf2   :  { %2960 = vmatmul.mubr.msk.f32.vlgmr.msra.gmra.mrb[0].mxu0 %vm129_vm1, %v144_v28 }
  0xf3   :  { %2974 = vmatprep.mubr.msk.f32.mxu0 %vm3375_vm2, %v3376_v17 }
 0x1c5   :  { %v3569_v30 = vpop.f32.mrb[0].mxu0 }
 0x1c6   :  { %v242_v31 = vmul.f32 %v3567_v29, %v3569_v30  ;;  %v2961_v32 = vpop.f32.mrb[1].mxu0  ;;  %v227_v34 = vmul.f32 %v3574_v33, %v3569_v30  ;;  %v237_v36 = vmul.f32 %v3579_v35, %v3569_v30  ;;  %v222_v40 = vmul.f32 %v3569_v30, %v3586_v38 }
 0x1c8   :  { %244 = vrot.lane.b32.xlu1 %v242_v31, %s3377_s23 }
 0x1cc   :  { %229 = vrot.lane.b32.xlu1 %v227_v34, %s3377_s23 }
 0x23a   :  { %v245_v37 = vpop.permute.xlu1 %244 }
 0x23b   :  { %v247_v39 = vadd.f32 %v245_v37, %v237_v36 }
 0x23d   :  { %253 = vrot.lane.b32.xlu1 %v247_v39, %s3378_s12 }
 0x23e   :  { %v230_v41 = vpop.permute.xlu1 %229 }
 0x23f   :  { %v3591_v42 = vadd.f32 %v230_v41, %v222_v40 }
 0x241   :  { %419 = vrot.lane.b32.xlu1 %v3591_v42, %s3380_s18 }
 0x2af   :  { %v254_v43 = vpop.permute.xlu1 %253 }
 0x2b0   :  { %2963 = vmatpush3.xpose.msk.msra.mxu1 %vm255_vm3, %v254_v43  ;;  %2973 = vmatpush3.xpose.msk.msra.mxu0 %vm255_vm3, %v254_v43 }
 0x2b1   :  { %2967 = vmatprep.subr.mxu1 %v3376_v17  ;;  %2982 = vmatprep.subr.mxu0 %v3376_v17 }
 0x2b3   :  { %2965 = vmatmul.mubr.msk.f32.vlgmr.msra.gmra.mrb[0].mxu1 %vm255_vm3, %v3591_v42  ;;  %v420_v44 = vpop.permute.xlu1 %419 }
 0x2b4   :  { %2975 = vmatmul.mubr.msk.f32.vlgmr.msra.gmra.mrb[2].mxu0 %vm255_vm3, %v420_v44  ;;  %2969 = vmatprep.mubr.msk.f32.mxu1 %vm3375_vm2, %v3376_v17 }
 0x2b5   :  { %2984 = vmatprep.mubr.msk.f32.mxu0 %vm3375_vm2, %v3376_v17  ;;  %2983 = vmatpush3.msra.mxu0 %v249_v0 }
 0x2b6   :  { %2992 = vmatprep.subr.mxu0 %v3376_v17 }
 0x386   :  { %v327_v46 = vpop.f32.mrb[0].mxu1 }
 0x387   :  { %v328_v47 = vadd.f32 %v327_v46, %v3606_v45  ;;  %v2966_v48 = vpop.f32.mrb[1].mxu1  ;;  %v489_v49 = vpop.f32.mrb[2].mxu0 }
 0x388   :  { %v490_v50 = vadd.f32 %v489_v49, %v3606_v45  ;;  %v2976_v51 = vpop.f32.mrb[3].mxu0 }
 0x389   :  { %v331_v52 = vsel %vm255_vm3, %v328_v47, -inf }
 0x38a   :  { %332 = vmax.xlane.f32.xlu1 %v331_v52  ;;  %v493_v53 = vsel %vm255_vm3, %v490_v50, -inf }
 0x38b   :  { %494 = vmax.xlane.f32.xlu0 %v493_v53 }
 0x417   :  { %v333_v54 = vpop.xlane.xlu1 %332 }
 0x418   :  { %v334_v55 = vsub.f32 %v328_v47, %v333_v54  ;;  %v495_v56 = vpop.xlane.xlu0 %494  ;;  %v251_v54 = vld [vmem:[%s3949_s3 + $0x18] sm:$0xff] }
 0x419   :  { %v496_v57 = vsub.f32 %v490_v50, %v495_v56 }
 0x41a   :  { %v335_v58 = vmul.f32 1.442695, %v334_v55 }
 0x41b   :  { %v497_v59 = vmul.f32 1.442695, %v496_v57 }
 0x41c   :  { %3237 = vpow2.f32 %v335_v58 }
 0x41d   :  { %3239 = vpow2.f32 %v497_v59 }
 0x426   :  { %v3238_v60 = vpop.eup %3237 }
 0x427   :  { %v3240_v61 = vpop.eup %3239  ;;  %v337_v62 = vsel %vm255_vm3, %v3238_v60, 0.0 }
 0x428   :  { %338 = vadd.xlane.f32.xlu0 %v337_v62  ;;  %v499_v63 = vsel %vm255_vm3, %v3240_v61, 0.0 }
 0x429   :  { %500 = vadd.xlane.f32.xlu1 %v499_v63 }
 0x43a   :  { %725 = vrot.lane.b32.xlu1 %v247_v39, %s3381_s8 }
 0x43e   :  { %723 = vrot.lane.b32.xlu1 %v3591_v42, %s3382_s27  ;;  %343 = vrot.lane.b32.xlu0 %v3569_v30, %s3383_s13 }
 0x4b5   :  { %v339_v1 = vpop.xlane.xlu0 %338 }
 0x4b6   :  { %3241 = vrcp.f32 %v339_v1  ;;  %v501_v2 = vpop.xlane.xlu1 %500 }
 0x4b7   :  { %3243 = vrcp.f32 %v501_v2 }
 0x4b9   :  { %v344_v3 = vpop.permute.xlu0 %343 }
 0x4ba   :  { %2968 = vmatpush3.msra.mxu1 %v344_v3  ;;  %v726_v12 = vpop.permute.xlu1 %725 }
 0x4bb   :  { %2977 = vmatprep.subr.mxu1 %v3376_v17 }
 0x4be   :  { %v724_v16 = vpop.permute.xlu1 %723 }
 0x4c0   :  { %v3242_v4 = vpop.eup %3241 }
 0x4c1   :  { %v341_v5 = vmul.f32 %v3242_v4, %v3238_v60  ;;  %v3244_v6 = vpop.eup %3243 }
 0x4c2   :  { %v503_v7 = vmul.f32 %v3244_v6, %v3240_v61  ;;  %v1212_v6 = vld [vmem:[%s3950_s4 + $0x8] sm:$0xff] }
 0x4c3   :  { %2970 = vmatmul.mubr.msk.f32.vlgmr.msra.gmra.mrb[2].mxu1 %vm255_vm3, %v341_v5  ;;  %v1211_v5 = vld [vmem:[%s3950_s4] sm:$0xff] }
 0x4c4   :  { %2978 = vmatpush3.msra.mxu1 %v344_v3  ;;  %2979 = vmatprep.mubr.msk.f32.mxu1 %vm3375_vm2, %v3376_v17 }
 0x4c5   :  { %2987 = vmatprep.subr.mxu1 %v3376_v17 }
 0x4c7   :  { %2980 = vmatmul.mubr.msk.f32.vlgmr.msra.gmra.mrb[4].mxu1 %vm255_vm3, %v503_v7  ;;  %v3171_v7 = vpack.c.bf16 %v1212_v6, %v1211_v5 }
 0x4c8   :  { %2989 = vmatprep.mubr.msk.f32.mxu1 %vm3375_vm2, %v3376_v17  ;;  %2988 = vmatpush3.msra.mxu1 %v248_v9  ;;  %v1214_v9 = vld [vmem:[%s3950_s4 + $0x18] sm:$0xff] }
 0x4c9   :  { %2997 = vmatprep.subr.mxu1 %v3376_v17 }
 0x596   :  { %v415_v10 = vpop.f32.mrb[2].mxu1 }
 0x597   :  { %v2971_v11 = vpop.f32.mrb[3].mxu1  ;;  %2990 = vmatmul.mubr.msk.f32.vlgmr.msra.gmra.mrb[6].mxu1 %vm255_vm3, %v415_v10 }
 0x598   :  { %2999 = vmatprep.mubr.msk.f32.mxu1 %vm3375_vm2, %v3376_v17 }
 0x59a   :  { %v573_v13 = vpop.f32.mrb[4].mxu1 }
 0x59b   :  { %v2981_v15 = vpop.f32.mrb[5].mxu1  ;;  %2985 = vmatmul.mubr.msk.f32.vlgmr.msra.gmra.mrb[4].mxu0 %vm255_vm3, %v573_v13 }
 0x59c   :  { %2993 = vmatpush3.xpose.msk.msra.mxu0 %vm255_vm3, %v726_v12  ;;  %2994 = vmatprep.mubr.msk.f32.mxu0 %vm3375_vm2, %v3376_v17 }
 0x59d   :  { %3002 = vmatprep.subr.mxu0 %v3376_v17 }
 0x59f   :  { %2995 = vmatmul.mubr.msk.f32.vlgmr.msra.gmra.mrb[6].mxu0 %vm255_vm3, %v724_v16  ;;  %v2811_v16 = vld [vmem:[%s3953_s7] ss:$0 sm:$0xff] }
 0x5a0   :  { %3004 = vmatprep.mubr.msk.f32.mxu0 %vm3375_vm2, %v3376_v17 }
 0x66a   :  { %v719_v18 = vpop.f32.mrb[6].mxu1 }
 0x66b   :  { %v2991_v19 = vpop.f32.mrb[7].mxu1 }
 0x66e   :  { %v646_v20 = vpop.f32.mrb[4].mxu0 }
 0x66f   :  { %v720_v21 = vadd.f32 %v719_v18, %v646_v20  ;;  %v2986_v22 = vpop.f32.mrb[5].mxu0  ;;  %v1300_v20 = vld [vmem:[%s3951_s5] sm:$0xff] }
 0x670   :  { %v1302_v22 = vld [vmem:[%s3951_s5 + $0x10] sm:$0xff] }
 0x672   :  { %v797_v23 = vpop.f32.mrb[6].mxu0 }
 0x673   :  { %v798_v24 = vadd.f32 %v797_v23, %v3606_v45  ;;  %v2996_v25 = vpop.f32.mrb[7].mxu0 }
 0x675   :  { %v801_v26 = vsel %vm255_vm3, %v798_v24, -inf }
 0x676   :  { %802 = vmax.xlane.f32.xlu0 %v801_v26  ;;  %v1304_v26 = vld [vmem:[%s3951_s5 + $0x20] sm:$0xff] }
 0x68c   :  { %812 = vrot.lane.b32.xlu0 %v3569_v30, %s3384_s21  ;;  %v250_v30 = vld [vmem:[%s3949_s3 + $0x10] sm:$0xff] }
 0x68d   :  { %3003 = vmatpush3.msra.mxu0 %v250_v30 }
 0x68e   :  { %3012 = vmatprep.subr.mxu0 %v3376_v17 }
 0x703   :  { %v803_v27 = vpop.xlane.xlu0 %802 }
 0x704   :  { %v804_v28 = vsub.f32 %v798_v24, %v803_v27  ;;  %v1303_v24 = vld [vmem:[%s3951_s5 + $0x18] sm:$0xff]  ;;  %v1305_v27 = vld [vmem:[%s3951_s5 + $0x28] sm:$0xff] }
 0x705   :  { %v3180_v25 = vpack.c.bf16 %v1303_v24, %v1302_v22 }
 0x706   :  { %v805_v31 = vmul.f32 1.442695, %v804_v28  ;;  %v3183_v28 = vpack.c.bf16 %v1305_v27, %v1304_v26 }
 0x707   :  { %v813_v32 = vpop.permute.xlu0 %812 }
 0x708   :  { %3245 = vpow2.f32 %v805_v31  ;;  %2998 = vmatpush3.msra.mxu1 %v813_v32  ;;  %v1306_v31 = vld [vmem:[%s3951_s5 + $0x30] sm:$0xff] }
 0x709   :  { %3007 = vmatprep.subr.mxu1 %v3376_v17 }
 0x712   :  { %v3246_v34 = vpop.eup %3245 }
 0x713   :  { %v807_v36 = vsel %vm255_vm3, %v3246_v34, 0.0 }
 0x714   :  { %808 = vadd.xlane.f32.xlu1 %v807_v36 }
 0x725   :  { %962 = vrot.lane.b32.xlu1 %v3591_v42, %s3385_s22 }
 0x7a1   :  { %v809_v37 = vpop.xlane.xlu1 %808 }
 0x7a2   :  { %3247 = vrcp.f32 %v809_v37 }
 0x7a5   :  { %v963_v41 = vpop.permute.xlu1 %962 }
 0x7ac   :  { %v3248_v39 = vpop.eup %3247 }
 0x7ad   :  { %v811_v40 = vmul.f32 %v3248_v39, %v3246_v34 }
 0x7af   :  { %3000 = vmatmul.mubr.msk.f32.vlgmr.msra.gmra.mrb[8].mxu1 %vm255_vm3, %v811_v40 }
 0x7b0   :  { %3008 = vmatpush3.xpose.msk.msra.mxu1 %vm255_vm3, %v726_v12  ;;  %3009 = vmatprep.mubr.msk.f32.mxu1 %vm3375_vm2, %v3376_v17 }
 0x7b1   :  { %3017 = vmatprep.subr.mxu1 %v3376_v17 }
 0x7b3   :  { %3010 = vmatmul.mubr.msk.f32.vlgmr.msra.gmra.mrb[10].mxu1 %vm255_vm3, %v963_v41 }
 0x7b4   :  { %3019 = vmatprep.mubr.msk.f32.mxu1 %vm3375_vm2, %v3376_v17  ;;  %3018 = vmatpush3.msra.mxu1 %v251_v54  ;;  %v2819_v54 = vld [vmem:[%s3948_s2 + $0x30] sm:$0xff] }
 0x7b5   :  { %3176 = vmatprep.subr.bf16.mxu1 %v3374_v14 }
 0x882   :  { %v884_v42 = vpop.f32.mrb[8].mxu1 }
 0x883   :  { %v3001_v43 = vpop.f32.mrb[9].mxu1  ;;  %3005 = vmatmul.mubr.msk.f32.vlgmr.msra.gmra.mrb[8].mxu0 %vm255_vm3, %v884_v42 }
 0x884   :  { %3013 = vmatpush3.msra.mxu0 %v813_v32  ;;  %3014 = vmatprep.mubr.msk.f32.mxu0 %vm3375_vm2, %v3376_v17  ;;  %v1307_v32 = vld [vmem:[%s3951_s5 + $0x38] sm:$0xff] }
 0x885   :  { %3170 = vmatprep.subr.bf16.mxu0 %v3374_v14  ;;  %v3186_v34 = vpack.c.bf16 %v1307_v32, %v1306_v31 }
 0x886   :  { %v1032_v44 = vpop.f32.mrb[10].mxu1 }
 0x887   :  { %v1033_v46 = vadd.f32 %v1032_v44, %v3606_v45  ;;  %v3011_v47 = vpop.f32.mrb[11].mxu1 }
 0x889   :  { %v1036_v48 = vsel %vm255_vm3, %v1033_v46, -inf }
 0x88a   :  { %1037 = vmax.xlane.f32.xlu0 %v1036_v48 }
 0x917   :  { %v1038_v49 = vpop.xlane.xlu0 %1037 }
 0x918   :  { %v1039_v50 = vsub.f32 %v1033_v46, %v1038_v49 }
 0x91a   :  { %v1040_v51 = vmul.f32 1.442695, %v1039_v50 }
 0x91c   :  { %3249 = vpow2.f32 %v1040_v51  ;;  %v2817_v51 = vld [vmem:[%s3948_s2 + $0x20] sm:$0xff] }
 0x926   :  { %v3250_v52 = vpop.eup %3249 }
 0x927   :  { %v1042_v53 = vsel %vm255_vm3, %v3250_v52, 0.0 }
 0x928   :  { %1043 = vadd.xlane.f32.xlu1 %v1042_v53 }
 0x956   :  { %v957_v55 = vpop.f32.mrb[8].mxu0 }
 0x957   :  { %v961_v56 = vadd.f32 %v957_v55, %v720_v21  ;;  %v3006_v57 = vpop.f32.mrb[9].mxu0  ;;  %v1301_v21 = vld [vmem:[%s3951_s5 + $0x8] sm:$0xff]  ;;  %v2820_v55 = vld [vmem:[%s3948_s2 + $0x38] sm:$0xff] }
 0x958   :  { %v3177_v23 = vpack.c.bf16 %v1301_v21, %v1300_v20 }
 0x9b5   :  { %v1044_v58 = vpop.xlane.xlu1 %1043 }
 0x9b6   :  { %3251 = vrcp.f32 %v1044_v58 }
 0x9c0   :  { %v3252_v59 = vpop.eup %3251 }
 0x9c1   :  { %v1046_v60 = vmul.f32 %v3252_v59, %v3250_v52  ;;  %v2818_v52 = vld [vmem:[%s3948_s2 + $0x28] sm:$0xff] }
 0x9c2   :  { %v3189_v53 = vpack.c.bf16 %v2818_v52, %v2817_v51 }
 0x9c3   :  { %3015 = vmatmul.mubr.msk.f32.vlgmr.msra.gmra.mrb[10].mxu0 %vm255_vm3, %v1046_v60 }
 0x9c4   :  { %3030 = vmatprep.mubr.msk.f32.mxu0 %vm3375_vm2, %v3376_v17  ;;  %3172 = vmatpush3.bf16.msra.mxu0 %v3171_v7 }
 0x9c5   :  { %3173 = vmatprep.subr.bf16.mxu0 %v3374_v14 }
 0xa96   :  { %v1116_v61 = vpop.f32.mrb[10].mxu0 }
 0xa97   :  { %v3016_v62 = vpop.f32.mrb[11].mxu0  ;;  %3020 = vmatmul.mubr.msk.f32.vlgmr.msra.gmra.mrb[12].mxu1 %vm255_vm3, %v1116_v61  ;;  %v2816_v61 = vld [vmem:[%s3952_s6 + $0x1] ss:$0 sm:$0xff] }
 0xa98   :  { %3049 = vmatprep.mubr.msk.f32.mxu1 %vm3375_vm2, %v3376_v17  ;;  %3178 = vmatpush3.bf16.msra.mxu1 %v3177_v23 }
 0xa99   :  { %3179 = vmatprep.subr.bf16.mxu1 %v3374_v14 }
 0xa9c   :  { %3181 = vmatpush3.bf16.msra.mxu1 %v3180_v25 }
 0xa9d   :  { %3182 = vmatprep.subr.bf16.mxu1 %v3374_v14 }
 0xaa0   :  { %3184 = vmatpush3.bf16.msra.mxu1 %v3183_v28  ;;  %v2823_v28 = vld [vmem:[%s3949_s3 + $0x28] sm:$0xff] }
 0xaa1   :  { %3185 = vmatprep.subr.bf16.mxu1 %v3374_v14 }
 0xaa4   :  { %3187 = vmatpush3.bf16.msra.mxu1 %v3186_v34 }
 0xaa5   :  { %3068 = vmatprep.subr.mxu1 %v3376_v17 }
 0xb6a   :  { %v1189_v63 = vpop.f32.mrb[12].mxu1 }
 0xb6b   :  { %v1193_v0 = vadd.f32 %v1189_v63, %v961_v56  ;;  %v3021_v1 = vpop.f32.mrb[13].mxu1  ;;  %v3192_v56 = vpack.c.bf16 %v2820_v55, %v2819_v54 }
 0xb6d   :  { %v1194_v2 = vadd.f32 %v1193_v0, %v3527_v8  ;;  %v1213_v8 = vld [vmem:[%s3950_s4 + $0x10] sm:$0xff] }
 0xb6e   :  { %v3174_v10 = vpack.c.bf16 %v1214_v9, %v1213_v8 }
 0xb6f   :  { %v1196_v3 = vmul.f32 %v1194_v2, %v1194_v2 }
 0xb70   :  { %3175 = vmatpush3.bf16.msra.mxu0 %v3174_v10 }
 0xb71   :  { %v1197_v4 = vsel %vm129_vm1, %v1196_v3, 0.0  ;;  %3188 = vmatprep.subr.bf16.mxu0 %v3374_v14 }
 0xb72   :  { %1198 = vadd.xlane.f32.xlu0 %v1197_v4 }
 0xbff   :  { %v1199_v11 = vpop.xlane.xlu0 %1198 }
 0xc00   :  { %v1200_v12 = vmul.f32 0.03125, %v1199_v11 }
 0xc02   :  { %v1201_v13 = vadd.f32 1e-05, %v1200_v12 }
 0xc04   :  { %3253 = vrsqrt.f32 %v1201_v13 }
 0xc0e   :  { %v3254_v15 = vpop.eup %3253 }
 0xc0f   :  { %v1203_v18 = vmul.f32 %v3254_v15, %v1194_v2 }
 0xc11   :  { %v1210_v19 = vmul.f32 %v2811_v16, %v1203_v18 }
 0xc13   :  { %3031 = vmatmul.mubr.msk.f32.vlgmr.msra.gmra.mrb[12].mxu0 %vm129_vm1, %v1210_v19 }
 0xc14   :  { %3060 = vmatprep.mubr.msk.f32.mxu0 %vm3375_vm2, %v3376_v17  ;;  %3190 = vmatpush3.bf16.msra.mxu0 %v3189_v53 }
 0xc15   :  { %3191 = vmatprep.subr.bf16.mxu0 %v3374_v14 }
 0xc18   :  { %3193 = vmatpush3.bf16.msra.mxu0 %v3192_v56 }
 0xc19   :  { %3063 = vmatprep.subr.mxu0 %v3376_v17 }
 0xce6   :  { %v1284_v36 = vpop.f32.mrb[12].mxu0 }
 0xce7   :  { %1296 = vrot.lane.b32.xlu0 %v1284_v36, %s3377_s23  ;;  %v3032_v30 = vpop.f32.mrb[13].mxu0  ;;  %v2813_v37 = vmul.f32 -1.442695, %v1284_v36 }
 0xce9   :  { %3255 = vpow2.f32 %v2813_v37 }
 0xcf3   :  { %v3256_v39 = vpop.eup %3255 }
 0xcf4   :  { %v1291_v40 = vadd.f32 1.0, %v3256_v39 }
 0xcf6   :  { %3257 = vrcp.f32 %v1291_v40  ;;  %v2822_v40 = vld [vmem:[%s3949_s3 + $0x20] sm:$0xff] }
 0xd00   :  { %v3258_v41 = vpop.eup %3257 }
 0xd01   :  { %v1294_v42 = vmul.f32 %v3258_v41, %v1284_v36 }
 0xd59   :  { %v1297_v43 = vpop.permute.xlu0 %1296 }
 0xd5a   :  { %v1299_v44 = vmul.f32 %v1297_v43, %v1294_v42 }
 0xd5c   :  { %3050 = vmatmul.mubr.msk.f32.vlgmr.msra.gmra.mrb[14].mxu1 %vm1308_vm4, %v1299_v44 }
 0xd5d   :  { %3070 = vmatprep.mubr.msk.f32.mxu1 %vm3375_vm2, %v3376_v17 }
 0xe2f   :  { %v1378_v46 = vpop.f32.mrb[14].mxu1 }
 0xe30   :  { %v3737_v47 = vadd.f32 %v1378_v46, %v1194_v2  ;;  %v3051_v48 = vpop.f32.mrb[15].mxu1 }
 0xe32   :  { %v1385_v49 = vmul.f32 %v3737_v47, %v3737_v47 }
 0xe34   :  { %v1386_v50 = vsel %vm129_vm1, %v1385_v49, 0.0 }
 0xe35   :  { %1387 = vadd.xlane.f32.xlu1 %v1386_v50 }
 0xec2   :  { %v1388_v57 = vpop.xlane.xlu1 %1387 }
 0xec3   :  { %v1389_v58 = vmul.f32 0.03125, %v1388_v57 }
 0xec5   :  { %v1390_v59 = vadd.f32 1e-05, %v1389_v58 }
 0xec7   :  { %3259 = vrsqrt.f32 %v1390_v59 }
 0xed1   :  { %v3260_v60 = vpop.eup %3259 }
 0xed2   :  { %v1392_v62 = vmul.f32 %v3260_v60, %v3737_v47 }
 0xed4   :  { %v1399_v63 = vmul.f32 %v2816_v61, %v1392_v62 }
 0xed6   :  { %3061 = vmatmul.mubr.msk.f32.vlgmr.msra.gmra.mrb[14].mxu0 %vm129_vm1, %v1399_v63 }
 0xed7   :  { %3065 = vmatprep.mubr.msk.f32.mxu0 %vm3375_vm2, %v3376_v17 }
 0xfa9   :  { %v3763_v0 = vpop.f32.mrb[14].mxu0 }
 0xfaa   :  { %v3062_v1 = vpop.f32.mrb[15].mxu0  ;;  %v1486_v2 = vmul.f32 %v3763_v0, %v3567_v29  ;;  %v1479_v3 = vmul.f32 %v3763_v0, %v3574_v33  ;;  %v1485_v4 = vmul.f32 %v3763_v0, %v3579_v35  ;;  %v1478_v5 = vmul.f32 %v3763_v0, %v3586_v38 }
 0xfab   :  { %v2824_v1 = vld [vmem:[%s3949_s3 + $0x30] sm:$0xff] }
 0xfac   :  { %1488 = vrot.lane.b32.xlu1 %v1486_v2, %s3377_s23  ;;  %1481 = vrot.lane.b32.xlu0 %v1479_v3, %s3377_s23 }
0x101e   :  { %v1489_v6 = vpop.permute.xlu1 %1488  ;;  %v1482_v7 = vpop.permute.xlu0 %1481 }
0x101f   :  { %v1491_v8 = vadd.f32 %v1489_v6, %v1485_v4  ;;  %v3775_v9 = vadd.f32 %v1482_v7, %v1478_v5 }
0x1021   :  { %1498 = vrot.lane.b32.xlu1 %v1491_v8, %s3378_s12  ;;  %1663 = vrot.lane.b32.xlu0 %v3775_v9, %s3380_s18 }
0x1093   :  { %v1499_v29 = vpop.permute.xlu1 %1498  ;;  %v1664_v33 = vpop.permute.xlu0 %1663 }
0x1094   :  { %3064 = vmatpush3.xpose.msk.msra.mxu0 %vm255_vm3, %v1499_v29 }
0x1095   :  { %3073 = vmatprep.subr.mxu0 %v3376_v17 }
0x1097   :  { %3066 = vmatmul.mubr.msk.f32.vlgmr.msra.gmra.mrb[16].mxu0 %vm255_vm3, %v3775_v9 }
0x1098   :  { %3074 = vmatpush3.xpose.msk.msra.mxu0 %vm255_vm3, %v1499_v29  ;;  %3075 = vmatprep.mubr.msk.f32.mxu0 %vm3375_vm2, %v3376_v17 }
0x1099   :  { %3083 = vmatprep.subr.mxu0 %v3376_v17 }
0x109b   :  { %3076 = vmatmul.mubr.msk.f32.vlgmr.msra.gmra.mrb[18].mxu0 %vm255_vm3, %v1664_v33 }
0x109c   :  { %3085 = vmatprep.mubr.msk.f32.mxu0 %vm3375_vm2, %v3376_v17  ;;  %3084 = vmatpush3.msra.mxu0 %v2823_v28  ;;  %v2844_v28 = vld [vmem:[%s3950_s4 + $0x20] sm:$0xff] }
0x109d   :  { %3093 = vmatprep.subr.mxu0 %v3376_v17 }
0x116a   :  { %v1571_v35 = vpop.f32.mrb[16].mxu0 }
0x116b   :  { %v1572_v38 = vadd.f32 %v1571_v35, %v3606_v45  ;;  %v3067_v10 = vpop.f32.mrb[17].mxu0 }
0x116d   :  { %v1575_v11 = vsel %vm255_vm3, %v1572_v38, -inf }
0x116e   :  { %1576 = vmax.xlane.f32.xlu1 %v1575_v11  ;;  %v1733_v12 = vpop.f32.mrb[18].mxu0 }
0x116f   :  { %v1734_v13 = vadd.f32 %v1733_v12, %v3606_v45  ;;  %v3077_v15 = vpop.f32.mrb[19].mxu0  ;;  %v2825_v12 = vld [vmem:[%s3949_s3 + $0x38] sm:$0xff] }
0x1171   :  { %v1737_v16 = vsel %vm255_vm3, %v1734_v13, -inf }
0x1172   :  { %1738 = vmax.xlane.f32.xlu0 %v1737_v16 }
0x11fb   :  { %v1577_v18 = vpop.xlane.xlu1 %1576 }
0x11fc   :  { %v1578_v19 = vsub.f32 %v1572_v38, %v1577_v18 }
0x11fe   :  { %v1579_v20 = vmul.f32 1.442695, %v1578_v19 }
0x11ff   :  { %v1739_v21 = vpop.xlane.xlu0 %1738 }
0x1200   :  { %3261 = vpow2.f32 %v1579_v20  ;;  %v1740_v22 = vsub.f32 %v1734_v13, %v1739_v21 }
0x1202   :  { %v1741_v23 = vmul.f32 1.442695, %v1740_v22 }
0x1204   :  { %3263 = vpow2.f32 %v1741_v23 }
0x120a   :  { %v3262_v24 = vpop.eup %3261 }
0x120b   :  { %v1581_v25 = vsel %vm255_vm3, %v3262_v24, 0.0 }
0x120c   :  { %1582 = vadd.xlane.f32.xlu0 %v1581_v25 }
0x120e   :  { %v3264_v26 = vpop.eup %3263 }
0x120f   :  { %v1743_v27 = vsel %vm255_vm3, %v3264_v26, 0.0 }
0x1210   :  { %1744 = vadd.xlane.f32.xlu1 %v1743_v27 }
0x1221   :  { %1969 = vrot.lane.b32.xlu1 %v1491_v8, %s3381_s8 }
0x1222   :  { %1587 = vrot.lane.b32.xlu0 %v3763_v0, %s3383_s13 }
0x1225   :  { %1967 = vrot.lane.b32.xlu1 %v3775_v9, %s3382_s27 }
0x1299   :  { %v1583_v31 = vpop.xlane.xlu0 %1582 }
0x129a   :  { %3265 = vrcp.f32 %v1583_v31  ;;  %v2845_v31 = vld [vmem:[%s3950_s4 + $0x28] sm:$0xff] }
0x129d   :  { %v1745_v32 = vpop.xlane.xlu1 %1744  ;;  %v1588_v34 = vpop.permute.xlu0 %1587 }
0x129e   :  { %3267 = vrcp.f32 %v1745_v32  ;;  %3069 = vmatpush3.msra.mxu1 %v1588_v34  ;;  %v3195_v32 = vpack.c.bf16 %v2845_v31, %v2844_v28 }
0x129f   :  { %3078 = vmatprep.subr.mxu1 %v3376_v17 }
0x12a1   :  { %v1970_v43 = vpop.permute.xlu1 %1969 }
0x12a4   :  { %v3266_v36 = vpop.eup %3265 }
0x12a5   :  { %v1585_v30 = vmul.f32 %v3266_v36, %v3262_v24  ;;  %v1968_v48 = vpop.permute.xlu1 %1967 }
0x12a7   :  { %3071 = vmatmul.mubr.msk.f32.vlgmr.msra.gmra.mrb[16].mxu1 %vm255_vm3, %v1585_v30 }
0x12a8   :  { %v3268_v37 = vpop.eup %3267  ;;  %3079 = vmatpush3.msra.mxu1 %v1588_v34  ;;  %3080 = vmatprep.mubr.msk.f32.mxu1 %vm3375_vm2, %v3376_v17  ;;  %v2847_v34 = vld [vmem:[%s3950_s4 + $0x38] sm:$0xff] }
0x12a9   :  { %v1747_v39 = vmul.f32 %v3268_v37, %v3264_v26  ;;  %3088 = vmatprep.subr.mxu1 %v3376_v17 }
0x12ab   :  { %3081 = vmatmul.mubr.msk.f32.vlgmr.msra.gmra.mrb[18].mxu1 %vm255_vm3, %v1747_v39 }
0x12ac   :  { %3090 = vmatprep.mubr.msk.f32.mxu1 %vm3375_vm2, %v3376_v17  ;;  %3089 = vmatpush3.msra.mxu1 %v2822_v40 }
0x12ad   :  { %3098 = vmatprep.subr.mxu1 %v3376_v17 }
0x137a   :  { %v1659_v41 = vpop.f32.mrb[16].mxu1 }
0x137b   :  { %v3072_v42 = vpop.f32.mrb[17].mxu1  ;;  %3091 = vmatmul.mubr.msk.f32.vlgmr.msra.gmra.mrb[20].mxu1 %vm255_vm3, %v1659_v41  ;;  %v2843_v41 = vld [vmem:[%s3953_s7 + $0x1] ss:$0 sm:$0xff] }
0x137c   :  { %3100 = vmatprep.mubr.msk.f32.mxu1 %vm3375_vm2, %v3376_v17 }
0x137e   :  { %v1817_v44 = vpop.f32.mrb[18].mxu1 }
0x137f   :  { %v3082_v46 = vpop.f32.mrb[19].mxu1  ;;  %3086 = vmatmul.mubr.msk.f32.vlgmr.msra.gmra.mrb[20].mxu0 %vm255_vm3, %v1817_v44  ;;  %v2850_v44 = vld [vmem:[%s3951_s5 + $0x40] sm:$0xff] }
0x1380   :  { %3094 = vmatpush3.xpose.msk.msra.mxu0 %vm255_vm3, %v1970_v43  ;;  %3095 = vmatprep.mubr.msk.f32.mxu0 %vm3375_vm2, %v3376_v17  ;;  %v2851_v46 = vld [vmem:[%s3951_s5 + $0x48] sm:$0xff] }
0x1381   :  { %3103 = vmatprep.subr.mxu0 %v3376_v17 }
0x1383   :  { %3096 = vmatmul.mubr.msk.f32.vlgmr.msra.gmra.mrb[22].mxu0 %vm255_vm3, %v1968_v48  ;;  %v2852_v48 = vld [vmem:[%s3951_s5 + $0x50] sm:$0xff] }
0x1384   :  { %3105 = vmatprep.mubr.msk.f32.mxu0 %vm3375_vm2, %v3376_v17  ;;  %3104 = vmatpush3.msra.mxu0 %v2824_v1 }
0x1385   :  { %3113 = vmatprep.subr.mxu0 %v3376_v17 }
0x144e   :  { %v1963_v49 = vpop.f32.mrb[20].mxu1 }
0x144f   :  { %v3092_v50 = vpop.f32.mrb[21].mxu1 }
0x1450   :  { %v2853_v50 = vld [vmem:[%s3951_s5 + $0x58] sm:$0xff] }
0x1452   :  { %v1890_v51 = vpop.f32.mrb[20].mxu0 }
0x1453   :  { %v1964_v52 = vadd.f32 %v1963_v49, %v1890_v51  ;;  %v3087_v53 = vpop.f32.mrb[21].mxu0  ;;  %v3201_v49 = vpack.c.bf16 %v2851_v46, %v2850_v44  ;;  %v3204_v51 = vpack.c.bf16 %v2853_v50, %v2852_v48 }
0x1456   :  { %v2041_v54 = vpop.f32.mrb[22].mxu0 }
0x1457   :  { %v2042_v55 = vadd.f32 %v2041_v54, %v3606_v45  ;;  %v3097_v56 = vpop.f32.mrb[23].mxu0  ;;  %v2856_v54 = vld [vmem:[%s3951_s5 + $0x70] sm:$0xff] }
0x1459   :  { %v2045_v57 = vsel %vm255_vm3, %v2042_v55, -inf }
0x145a   :  { %2046 = vmax.xlane.f32.xlu0 %v2045_v57 }
0x1470   :  { %2056 = vrot.lane.b32.xlu0 %v3763_v0, %s3384_s21 }
0x14e7   :  { %v2047_v58 = vpop.xlane.xlu0 %2046 }
0x14e8   :  { %v2048_v59 = vsub.f32 %v2042_v55, %v2047_v58  ;;  %v2857_v55 = vld [vmem:[%s3951_s5 + $0x78] sm:$0xff] }
0x14e9   :  { %v3210_v56 = vpack.c.bf16 %v2857_v55, %v2856_v54 }
0x14ea   :  { %v2049_v60 = vmul.f32 1.442695, %v2048_v59 }
0x14eb   :  { %v2057_v61 = vpop.permute.xlu0 %2056 }
0x14ec   :  { %3269 = vpow2.f32 %v2049_v60  ;;  %3099 = vmatpush3.msra.mxu1 %v2057_v61 }
0x14ed   :  { %3108 = vmatprep.subr.mxu1 %v3376_v17 }
0x14f6   :  { %v3270_v62 = vpop.eup %3269 }
0x14f7   :  { %v2051_v63 = vsel %vm255_vm3, %v3270_v62, 0.0 }
0x14f8   :  { %2052 = vadd.xlane.f32.xlu1 %v2051_v63 }
0x1509   :  { %2206 = vrot.lane.b32.xlu1 %v3775_v9, %s3385_s22 }
0x1585   :  { %v2053_v0 = vpop.xlane.xlu1 %2052 }
0x1586   :  { %3271 = vrcp.f32 %v2053_v0 }
0x1589   :  { %v2207_v4 = vpop.permute.xlu1 %2206 }
0x1590   :  { %v3272_v2 = vpop.eup %3271 }
0x1591   :  { %v2055_v3 = vmul.f32 %v3272_v2, %v3270_v62 }
0x1593   :  { %3101 = vmatmul.mubr.msk.f32.vlgmr.msra.gmra.mrb[22].mxu1 %vm255_vm3, %v2055_v3 }
0x1594   :  { %3109 = vmatpush3.xpose.msk.msra.mxu1 %vm255_vm3, %v1970_v43  ;;  %3110 = vmatprep.mubr.msk.f32.mxu1 %vm3375_vm2, %v3376_v17 }
0x1595   :  { %3118 = vmatprep.subr.mxu1 %v3376_v17 }
0x1597   :  { %3111 = vmatmul.mubr.msk.f32.vlgmr.msra.gmra.mrb[24].mxu1 %vm255_vm3, %v2207_v4 }
0x1598   :  { %3120 = vmatprep.mubr.msk.f32.mxu1 %vm3375_vm2, %v3376_v17  ;;  %3119 = vmatpush3.msra.mxu1 %v2825_v12  ;;  %v3386_v12 = vmov 1966171168  }
0x1599   :  { %3200 = vmatprep.subr.bf16.mxu1 %v3374_v14 }
0x1666   :  { %v2128_v5 = vpop.f32.mrb[22].mxu1 }
0x1667   :  { %v3102_v6 = vpop.f32.mrb[23].mxu1  ;;  %3106 = vmatmul.mubr.msk.f32.vlgmr.msra.gmra.mrb[24].mxu0 %vm255_vm3, %v2128_v5 }
0x1668   :  { %3114 = vmatpush3.msra.mxu0 %v2057_v61  ;;  %3115 = vmatprep.mubr.msk.f32.mxu0 %vm3375_vm2, %v3376_v17 }
0x1669   :  { %3194 = vmatprep.subr.bf16.mxu0 %v3374_v14 }
0x166a   :  { %v2276_v7 = vpop.f32.mrb[24].mxu1 }
0x166b   :  { %v2277_v8 = vadd.f32 %v2276_v7, %v3606_v45  ;;  %v3112_v9 = vpop.f32.mrb[25].mxu1  ;;  %v2659_v7 = vld [vmem:[%s3960_s14] sm:$0xff] }
0x166d   :  { %v2280_v29 = vsel %vm255_vm3, %v2277_v8, -inf }
0x166e   :  { %2281 = vmax.xlane.f32.xlu0 %v2280_v29  ;;  %v2661_v29 = vld [vmem:[%s3960_s14 + $0x10] sm:$0xff] }
0x16fb   :  { %v2282_v33 = vpop.xlane.xlu0 %2281 }
0x16fc   :  { %v2283_v35 = vsub.f32 %v2277_v8, %v2282_v33  ;;  %v2660_v8 = vld [vmem:[%s3960_s14 + $0x8] sm:$0xff]  ;;  %v2662_v33 = vld [vmem:[%s3960_s14 + $0x18] sm:$0xff] }
0x16fd   :  { %v3213_v9 = vpack.c.bf16 %v2660_v8, %v2659_v7 }
0x16fe   :  { %v2284_v38 = vmul.f32 1.442695, %v2283_v35  ;;  %v3216_v35 = vpack.c.bf16 %v2662_v33, %v2661_v29 }
0x1700   :  { %3273 = vpow2.f32 %v2284_v38 }
0x170a   :  { %v3274_v10 = vpop.eup %3273 }
0x170b   :  { %v2286_v11 = vsel %vm255_vm3, %v3274_v10, 0.0 }
0x170c   :  { %2287 = vadd.xlane.f32.xlu1 %v2286_v11 }
0x173a   :  { %v2201_v45 = vpop.f32.mrb[24].mxu0 }
0x173b   :  { %v2205_v13 = vadd.f32 %v2201_v45, %v1964_v52  ;;  %v3107_v15 = vpop.f32.mrb[25].mxu0  ;;  %v2855_v52 = vld [vmem:[%s3951_s5 + $0x68] sm:$0xff]  ;;  %v2642_v45 = vunpack.c.l.s4 %v3386_v12 }
0x173d   :  { %v2643_v15 = vunpack.c.0.s8 %v2642_v45 }
0x1799   :  { %v2288_v16 = vpop.xlane.xlu1 %2287 }
0x179a   :  { %3275 = vrcp.f32 %v2288_v16 }
0x17a4   :  { %v3276_v18 = vpop.eup %3275 }
0x17a5   :  { %v2290_v19 = vmul.f32 %v3276_v18, %v3274_v10 }
0x17a7   :  { %3116 = vmatmul.mubr.msk.f32.vlgmr.msra.gmra.mrb[26].mxu0 %vm255_vm3, %v2290_v19 }
0x17a8   :  { %3131 = vmatprep.mubr.msk.f32.mxu0 %vm3375_vm2, %v3376_v17  ;;  %3196 = vmatpush3.bf16.msra.mxu0 %v3195_v32 }
0x17a9   :  { %3197 = vmatprep.subr.bf16.mxu0 %v3374_v14 }
0x187a   :  { %v2360_v20 = vpop.f32.mrb[26].mxu0 }
0x187b   :  { %v3117_v21 = vpop.f32.mrb[27].mxu0  ;;  %3121 = vmatmul.mubr.msk.f32.vlgmr.msra.gmra.mrb[26].mxu1 %vm255_vm3, %v2360_v20 }
0x187c   :  { %3150 = vmatprep.mubr.msk.f32.mxu1 %vm3375_vm2, %v3376_v17  ;;  %3202 = vmatpush3.bf16.msra.mxu1 %v3201_v49 }
0x187d   :  { %3203 = vmatprep.subr.bf16.mxu1 %v3374_v14 }
0x1880   :  { %3205 = vmatpush3.bf16.msra.mxu1 %v3204_v51 }
0x1881   :  { %3206 = vmatprep.subr.bf16.mxu1 %v3374_v14 }
0x194e   :  { %v2433_v22 = vpop.f32.mrb[26].mxu1 }
0x194f   :  { %v2437_v23 = vadd.f32 %v2433_v22, %v2205_v13  ;;  %v3122_v24 = vpop.f32.mrb[27].mxu1  ;;  %v2644_v13 = vlaneseq }
0x1951   :  { %v2438_v25 = vadd.f32 %v2437_v23, %v3737_v47  ;;  %v2846_v47 = vld [vmem:[%s3950_s4 + $0x30] sm:$0xff]  ;;  %v2645_v16 = vshrl.u32 %v2644_v13, 7  ;;  %v2741_v32 = vand.u32 127, %v2644_v13 }
0x1952   :  { %v3198_v36 = vpack.c.bf16 %v2847_v34, %v2846_v47 }
0x1953   :  { %v2441_v26 = vmul.f32 %v2438_v25, %v2438_v25  ;;  %v2646_v19 = vsub.s32 %v2643_v15, %v2645_v16 }
0x1954   :  { %3199 = vmatpush3.bf16.msra.mxu0 %v3198_v36 }
0x1955   :  { %v2442_v27 = vsel %vm129_vm1, %v2441_v26, 0.0  ;;  %3212 = vmatprep.subr.bf16.mxu0 %v3374_v14 }
0x1956   :  { %2443 = vadd.xlane.f32.xlu0 %v2442_v27 }
0x19e3   :  { %v2444_v30 = vpop.xlane.xlu0 %2443 }
0x19e4   :  { %v2445_v37 = vmul.f32 0.03125, %v2444_v30 }
0x19e6   :  { %v2446_v39 = vadd.f32 1e-05, %v2445_v37 }
0x19e8   :  { %3277 = vrsqrt.f32 %v2446_v39 }
0x19f2   :  { %v3278_v40 = vpop.eup %3277 }
0x19f3   :  { %v2448_v42 = vmul.f32 %v3278_v40, %v2438_v25 }
0x19f5   :  { %v2455_v43 = vmul.f32 %v2843_v41, %v2448_v42 }
0x19f7   :  { %3132 = vmatmul.mubr.msk.f32.vlgmr.msra.gmra.mrb[28].mxu0 %vm129_vm1, %v2455_v43 }
0x19f8   :  { %3161 = vmatprep.mubr.msk.f32.mxu0 %vm3375_vm2, %v3376_v17  ;;  %v2854_v17 = vld [vmem:[%s3951_s5 + $0x60] sm:$0xff]  ;;  %3214 = vmatpush3.bf16.msra.mxu0 %v3213_v9 }
0x19f9   :  { %v3207_v53 = vpack.c.bf16 %v2855_v52, %v2854_v17  ;;  %3215 = vmatprep.subr.bf16.mxu0 %v3374_v14 }
0x19fb   :  { %3208 = vmatpush3.bf16.msra.mxu1 %v3207_v53 }
0x19fc   :  { %3209 = vmatprep.subr.bf16.mxu1 %v3374_v14  ;;  %3217 = vmatpush3.bf16.msra.mxu0 %v3216_v35  ;;  %v2629_v14 = vld [vmem:[%s3965_s17] sm:$0x1] }
0x19ff   :  { %3211 = vmatpush3.bf16.msra.mxu1 %v3210_v56 }
0x1aca   :  { %v2530_v57 = vpop.f32.mrb[28].mxu0 }
0x1acb   :  { %2542 = vrot.lane.b32.xlu0 %v2530_v57, %s3377_s23  ;;  %v3133_v58 = vpop.f32.mrb[29].mxu0  ;;  %v2849_v59 = vmul.f32 -1.442695, %v2530_v57 }
0x1acd   :  { %3279 = vpow2.f32 %v2849_v59 }
0x1ad7   :  { %v3280_v60 = vpop.eup %3279 }
0x1ad8   :  { %v2537_v61 = vadd.f32 1.0, %v3280_v60 }
0x1ada   :  { %3281 = vrcp.f32 %v2537_v61 }
0x1ae4   :  { %v3282_v62 = vpop.eup %3281 }
0x1ae5   :  { %v2540_v63 = vmul.f32 %v3282_v62, %v2530_v57 }
0x1b3d   :  { %v2543_v1 = vpop.permute.xlu0 %2542 }
0x1b3e   :  { %v2545_v0 = vmul.f32 %v2543_v1, %v2540_v63 }
0x1b40   :  { %3151 = vmatmul.mubr.msk.f32.vlgmr.msra.gmra.mrb[28].mxu1 %vm1308_vm4, %v2545_v0 }
0x1c13   :  { %v2624_v2 = vpop.f32.mrb[28].mxu1 }
0x1c14   :  { %v2628_v3 = vadd.f32 %v2624_v2, %v2438_v25  ;;  %v3152_v4 = vpop.f32.mrb[29].mxu1 }
0x1c16   :  { %v2630_v5 = vmul.f32 %v2628_v3, %v2628_v3 }
0x1c18   :  { %v2632_v6 = vsel %vm2631_vm5, %v2630_v5, 0.0 }
0x1c19   :  { %2633 = vadd.xlane.f32.xlu1 %v2632_v6 }
0x1ca6   :  { %v2634_v38 = vpop.xlane.xlu1 %2633 }
0x1ca7   :  { %v2635_v10 = vmul.f32 0.03125, %v2634_v38 }
0x1ca9   :  { %v2636_v11 = vadd.f32 1e-05, %v2635_v10 }
0x1cab   :  { %3283 = vrsqrt.f32 %v2636_v11 }
0x1cb5   :  { %v3284_v18 = vpop.eup %3283 }
0x1cb6   :  { %v2638_v20 = vmul.f32 %v3284_v18, %v2628_v3 }
0x1cb8   :  { %v2640_v21 = vcombine.high %v2638_v20, %v2638_v20 }
0x1cba   :  { %v2647_v22 = vrot.slane %v2640_v21, %v2646_v19 }
0x1cbc   :  { %v2648_v23 = vcombine.high %v2647_v22, %v2647_v22 }
0x1cbe   :  { %v2655_v24 = vrot.slane %v2648_v23, %v2646_v19 }
0x1cc0   :  { %v2656_v25 = vcombine.high %v2655_v24, %v2655_v24 }
0x1cc2   :  { %v2658_v26 = vmul.f32 %v2656_v25, %v2629_v14 }
0x1cc4   :  { %3162 = vmatmul.mubr.msk.f32.vlgmr.msra.gmra.mrb[30].mxu0 %vm129_vm1, %v2658_v26 }
0x1d97   :  { %v2732_v27 = vpop.f32.mrb[30].mxu0 }
0x1d98   :  { %v3163_v28 = vpop.f32.mrb[31].mxu0  ;;  %v2737_v31 = vsel %vm2736_vm6, %v2732_v27, -inf }
0x1d99   :  { %2738 = vmax.xlane.f32.xlu1 %v2737_v31 }
0x1e26   :  { %v2739_v47 = vpop.xlane.xlu1 %2738 }
0x1e27   :  { %vm2742_vm7 = vcmp.eq.f32.partialorder %v2732_v27, %v2739_v47 }
0x1e28   :  { %v2743_v34 = vsel %vm2742_vm7, %v2741_v32, 64 }
0x1e29   :  { %v2744_v36 = vsel %vm2736_vm6, %v2743_v34, 2147483647 }
0x1e2a   :  { %v2746_v30 = vshra.s32 %v2744_v36, 16  ;;  %v2745_v39 = vand.u32 65535, %v2744_v36 }
0x1e2c   :  { %v2748_v37 = vcvt.s32.f32 %v2746_v30  ;;  %v2747_v41 = vcvt.s32.f32 %v2745_v39 }
0x1e2e   :  { %2749 = vmin.xlane.f32.xlu1 %v2748_v37 }
0x1ebb   :  { %v2750_v40 = vpop.xlane.xlu1 %2749 }
0x1ebc   :  { %vm2751_vm8 = vcmp.eq.f32.partialorder %v2748_v37, %v2750_v40  ;;  %v2756_v43 = vcvt.f32.s32 %v2750_v40 }
0x1ebd   :  { %v2752_v42 = vsel %vm2751_vm8, %v2747_v41, inf }
0x1ebe   :  { %2753 = vmin.xlane.f32.xlu1 %v2752_v42  ;;  %v2757_v46 = vshll.u32 %v2756_v43, 16 }
0x1f4b   :  { %v2754_v44 = vpop.xlane.xlu1 %2753 }
0x1f4c   :  { %v2755_v48 = vcvt.f32.s32 %v2754_v44 }
0x1f4e   :  { %v2758_v49 = vadd.s32 %v2757_v46, %v2755_v48 }
0x1f50   :  { %2760 = vst.msk [vmem:[#allocation10] sm:$0x1] %vm2759_vm9, %v2758_v49 }
0x1f51   :  { %3352 = shalt.err (!%p3349_p11)
}
0x1f52   :  { %s3966_s0 = sld [smem:[#allocation16_spill]] }
0x1f58   :  { %s3353_s11 = scalar_lea.hbm %s3966_s0, 16 }
0x1f59   :  { %p3354_p12 = scmp.ne.s32.totalorder %s3966_s0, %s3353_s11  ;;  %p3357_p13 = scmp.lt.u32.totalorder %s3353_s11, %s3966_s0 }
0x1f5b   :  { %p3359_p0 = pnand %p3357_p13, %p3354_p12 }
0x1f5d   :  { %3362 = shalt.err (!%p3359_p0)
}
0x1f5e   :  { %2770 = dma.vmem_to_hbm [thread:$0]  %s2768_s1, 16, %s3966_s0, [#allocation5]  }
0x1f5f   :  { %3369 = dma.done.wait [#allocation5], 16  }
0x1f60   :  { %3370 = vsyncadd [#allocation5], 4294967280 }
0x1f61   :  { %2774 = vsyncpa [#allocation4], 1 }
0x1f62   :  { %2775 = vsyncpa [#allocation9], 1 }
0x1f63   :  { %2776 = vsyncpa [#allocation5], 1 }
0x1f64   :  { %2777 = vsyncpa [#allocation6], 1 }

</bundles_post_ra>
